<compile_context>
chip_gen: v6e
topology: v6e:2x2x1
jax: 0.10.0
libtpu: 0.0.40
codegen_flags: <defaults>
</compile_context>

<pallas_src>
import functools
import math

import jax
import jax.numpy as jnp
from jax import lax
from jax.experimental import pallas as pl
from jax.experimental.pallas import tpu as pltpu

MASK_VALUE = -1000000.0   # same constant as sequence_mask(value=-1e6)
PAD_VALUE = -1e30         # padded key columns -> exactly zero softmax weight
INIT_M = -1e30            # finite "-inf" for the running max


def _flash_attn_kernel(lkt_ref, *refs, has_bias):
    """One grid step = (batch block, Q tile, K tile) with online softmax.

    lkt_ref : SMEM (B//nb,) int32 -- last K-tile index that contains any
              useful (unmasked, unpadded) key for this batch block.
    q_ref   : (nb, tq, D)   queries, already scaled by 1/sqrt(d)
    k_ref   : (nb, tk, D)
    v_ref   : (nb, tk, Dv)
    bias_ref: (nb, 1, tk)   additive mask (only present when has_bias)
    o_ref   : (nb, tq, Dv)
    scratch : m/l (nb, tq, 1) f32, acc (nb, tq, Dv) f32
    """
    if has_bias:
        q_ref, k_ref, v_ref, bias_ref, o_ref, m_scr, l_scr, acc_scr = refs
    else:
        q_ref, k_ref, v_ref, o_ref, m_scr, l_scr, acc_scr = refs

    b = pl.program_id(0)
    ki = pl.program_id(2)

    @pl.when(ki == 0)
    def _():
        m_scr[...] = jnp.full_like(m_scr, INIT_M)
        l_scr[...] = jnp.zeros_like(l_scr)
        acc_scr[...] = jnp.zeros_like(acc_scr)

    # Skip K tiles that contain only masked / padded keys (their softmax
    # contribution underflows to exactly 0 in f32, so skipping is exact).
    @pl.when(ki <= lkt_ref[b])
    def _():
        # scores = (Q/sqrt(d)) . K^T as a contraction on the feature dim
        s = lax.dot_general(q_ref[...], k_ref[...],
                            (((2,), (2,)), ((0,), (0,))),
                            preferred_element_type=jnp.float32)
        if has_bias:
            s = s + bias_ref[...]            # (nb, 1, tk) broadcasts over tq

        # ---- online softmax update (all f32) --------------------------------
        m_prev = m_scr[...]
        m_new = jnp.maximum(m_prev, jnp.max(s, axis=-1, keepdims=True))
        alpha = jnp.exp(m_prev - m_new)
        p = jnp.exp(s - m_new)
        l_scr[...] = alpha * l_scr[...] + jnp.sum(p, axis=-1, keepdims=True)
        pv = lax.dot_general(p.astype(v_ref.dtype), v_ref[...],
                             (((2,), (1,)), ((0,), (0,))),
                             preferred_element_type=jnp.float32)
        acc_scr[...] = alpha * acc_scr[...] + pv
        m_scr[...] = m_new

    @pl.when(ki == pl.num_programs(2) - 1)
    def _():
        # exact divide: once per block, essentially free, keeps f32 accuracy
        o_ref[...] = (acc_scr[...] / l_scr[...]).astype(o_ref.dtype)


# ---------------------------------------------------------------------------
# wrapper
# ---------------------------------------------------------------------------
def _round_up(x, m):
    return (x + m - 1) // m * m


def _pad_axis(x, axis, target):
    pad = target - x.shape[axis]
    if pad == 0:
        return x
    widths = [(0, 0)] * x.ndim
    widths[axis] = (0, pad)
    return jnp.pad(x, widths)


def _pick_tile(padded, preferred):
    t = max(128, min(preferred, padded))
    t -= t % 128
    while padded % t:
        t -= 128
    return t


def _pick_nb(b, qp, tq):
    """Fold batches only when Q is too short to fill a row tile; keep the
    combined parallel extent (B//nb)*(Qp//tq) >= 2 when possible (v7x 2 TCs)."""
    nb = max(1, min(b, 256 // qp)) if qp < 256 else 1
    while b % nb:
        nb -= 1
    while nb > 1 and (b // nb) * (qp // tq) < 2:
        nb -= 1
        while b % nb:
            nb -= 1
    return nb


def dot_product_attention(queries, keys, values, valid_lens=None, *,
                          tq=512, tk=512, cast_mxu_to_bf16=False,
                          vmem_limit_bytes=32 * 1024 * 1024):
    """queries: (B, Q, D), keys: (B, K, D), values: (B, K, Dv),
    valid_lens: None or (B,) ints (the 1-D case of masked_softmax)."""
    B, Q, D = queries.shape
    _, K, _ = keys.shape
    Dv = values.shape[-1]
    out_dtype = queries.dtype

    # fold 1/sqrt(d) into Q once (hoisted out of the per-K-tile loop)
    scale = 1.0 / math.sqrt(D)
    q = queries * scale
    k = keys
    v = values
    if cast_mxu_to_bf16:
        # optional MXU fast path for f32 callers (also halves HBM traffic);
        # accumulation stays f32 inside the kernel.
        q, k, v = (x.astype(jnp.bfloat16) for x in (q, k, v))

    # ---- pad only the tiled sequence dims to multiples of 128 ----------------
    # feature dims stay unpadded: a full-extent last block dim is legal and
    # avoids a large HBM-traffic tax when D, Dv << 128.
    Qp, Kp = _round_up(Q, 128), _round_up(K, 128)
    q = _pad_axis(q, 1, Qp)
    k = _pad_axis(k, 1, Kp)
    v = _pad_axis(v, 1, Kp)

    # ---- tiling ---------------------------------------------------------------
    tq = _pick_tile(Qp, tq)
    tk = _pick_tile(Kp, tk)
    nb = _pick_nb(B, Qp, tq)
    grid = (B // nb, Qp // tq, Kp // tk)

    # ---- mask bias + last-needed-K-tile schedule (scalar prefetch) ------------
    has_bias = (valid_lens is not None) or (Kp != K)
    if valid_lens is None:
        vl = jnp.full((B,), K, dtype=jnp.int32)
    else:
        vl = valid_lens.astype(jnp.int32)
    # TODO(synk): 2-D per-query valid_lens not implemented.
    needed = jnp.clip(jnp.minimum(vl, K), 1, K)           # >= 1 keeps l > 0
    last_tile = (needed + tk - 1) // tk - 1                # per batch
    lkt = jnp.max(last_tile.reshape(B // nb, nb), axis=1).astype(jnp.int32)

    q_spec = pl.BlockSpec((nb, tq, D), lambda b, qi, ki, lk: (b, qi, 0))
    k_spec = pl.BlockSpec((nb, tk, D),
                          lambda b, qi, ki, lk: (b, jnp.minimum(ki, lk[b]), 0))
    v_spec = pl.BlockSpec((nb, tk, Dv),
                          lambda b, qi, ki, lk: (b, jnp.minimum(ki, lk[b]), 0))
    in_specs = [q_spec, k_spec, v_spec]
    inputs = [q, k, v]
    if has_bias:
        # additive bias per key column: 0 valid, -1e6 masked, -1e30 padded
        col = jnp.arange(Kp, dtype=jnp.int32)[None, :]
        bias = jnp.where(col < vl[:, None], 0.0, MASK_VALUE)
        bias = jnp.where(col < K, bias, PAD_VALUE).astype(jnp.float32)
        bias = bias[:, None, :]                            # (B, 1, Kp)
        in_specs.append(pl.BlockSpec(
            (nb, 1, tk),
            lambda b, qi, ki, lk: (b, 0, jnp.minimum(ki, lk[b]))))
        inputs.append(bias)

    kernel = functools.partial(_flash_attn_kernel, has_bias=has_bias)

    grid_spec = pltpu.PrefetchScalarGridSpec(
        num_scalar_prefetch=1,
        grid=grid,
        in_specs=in_specs,
        out_specs=pl.BlockSpec((nb, tq, Dv), lambda b, qi, ki, lk: (b, qi, 0)),
        scratch_shapes=[
            pltpu.VMEM((nb, tq, 1), jnp.float32),      # running max m
            pltpu.VMEM((nb, tq, 1), jnp.float32),      # running denom l
            pltpu.VMEM((nb, tq, Dv), jnp.float32),     # output accumulator
        ],
    )

    out = pl.pallas_call(
        kernel,
        out_shape=jax.ShapeDtypeStruct((B, Qp, Dv), out_dtype),
        grid_spec=grid_spec,
        compiler_params=pltpu.CompilerParams(
            dimension_semantics=("parallel", "parallel", "arbitrary"),
            vmem_limit_bytes=vmem_limit_bytes),
    )(lkt, *inputs)

    return out[:, :Q, :]


# ---------------------------------------------------------------------------
# pure-JAX reference mirroring the PyTorch module (eval mode)
# ---------------------------------------------------------------------------
def _reference(queries, keys, values, valid_lens):
    d = queries.shape[-1]
    scores = jnp.einsum("bqd,bkd->bqk",
                        queries.astype(jnp.float32),
                        keys.astype(jnp.float32)) / math.sqrt(d)
    if valid_lens is not None:
        K = keys.shape[1]
        colr = jnp.arange(K)[None, None, :]
        mask = colr < valid_lens[:, None, None]
        scores = jnp.where(mask, scores, MASK_VALUE)
    weights = jax.nn.softmax(scores, axis=-1)
    return jnp.einsum("bqk,bkv->bqv", weights, values.astype(jnp.float32))


if __name__ == "__main__":
    root = jax.random.PRNGKey(0)

    def run_case(B, Q, K, D, Dv, valid, tol=2e-3, **kw):
        kq, kk, kv = jax.random.split(jax.random.fold_in(root, Q * 1000 + K), 3)
        q = jax.random.normal(kq, (B, Q, D), dtype=jnp.float32)
        k = jax.random.normal(kk, (B, K, D), dtype=jnp.float32)
        v = jax.random.normal(kv, (B, K, Dv), dtype=jnp.float32)
        vl = None if valid is None else jnp.array(valid, dtype=jnp.int32)
        out = jax.block_until_ready(dot_product_attention(q, k, v, vl, **kw))
        ref = _reference(q, k, v, vl)
        assert out.shape == (B, Q, Dv)
        err = float(jnp.max(jnp.abs(out.astype(jnp.float32) - ref)))
        assert err < tol, (err, (B, Q, K, D, Dv))

    # module's toy shapes (single tile, masked)
    run_case(2, 8, 8, 32, 32, [3, 6])
    # multi-tile Q and K: online-softmax accumulation + masked K-tile skipping
    run_case(2, 200, 300, 32, 32, [37, 250], tq=128, tk=128)
    # no user mask, padded keys (bias only from key padding)
    run_case(2, 8, 8, 32, 32, None)
    # no mask and no key padding: bias-less specialized kernel
    run_case(2, 128, 128, 32, 32, None)
    # optional bf16 MXU fast path for f32 callers (looser tolerance)
    run_case(2, 256, 384, 64, 64, [100, 384], tol=3e-2, cast_mxu_to_bf16=True)

    print("KERNEL_OK")
</pallas_src>

<mosaic_0001>
module attributes {stable_mosaic.version = 11 : i64} {
  func.func @_flash_attn_kernel(%arg0: i32, %arg1: i32, %arg2: i32, %arg3: memref<2xi32, #tpu.memory_space<smem>>, %arg4: memref<1x128x32xf32, #tpu.memory_space<vmem>>, %arg5: memref<1x128x32xf32, #tpu.memory_space<vmem>>, %arg6: memref<1x128x32xf32, #tpu.memory_space<vmem>>, %arg7: memref<1x1x128xf32, #tpu.memory_space<vmem>>, %arg8: memref<1x128x32xf32, #tpu.memory_space<vmem>>, %arg9: memref<1x128x1xf32, #tpu.memory_space<vmem>>, %arg10: memref<1x128x1xf32, #tpu.memory_space<vmem>>, %arg11: memref<1x128x32xf32, #tpu.memory_space<vmem>>) attributes {dimension_semantics = [#tpu.dimension_semantics<parallel>, #tpu.dimension_semantics<parallel>, #tpu.dimension_semantics<arbitrary>], iteration_bounds = array<i64: 2, 1, 1>, scalar_prefetch = 1 : i64, scratch_operands = 3 : i64, tpu.core_type = #tpu.core_type<tc>, window_params = [{transform_indices = @transform_0, window_bounds = array<i64: 1, 128, 32>}, {transform_indices = @transform_1, window_bounds = array<i64: 1, 128, 32>}, {transform_indices = @transform_2, window_bounds = array<i64: 1, 128, 32>}, {transform_indices = @transform_3, window_bounds = array<i64: 1, 1, 128>}, {transform_indices = @transform_4, window_bounds = array<i64: 1, 128, 32>}]} {
    %c0_i32 = arith.constant 0 : i32
    %0 = arith.cmpi eq, %arg2, %c0_i32 : i32
    %1 = arith.extui %0 : i1 to i32
    %c0_i32_0 = arith.constant 0 : i32
    %2 = arith.cmpi ne, %1, %c0_i32_0 : i32
    scf.if %2 {
      %cst = arith.constant -1.000000e+30 : f32
      %11 = vector.broadcast %cst : f32 to vector<1x128x1xf32>
      %c0 = arith.constant 0 : index
      %c0_4 = arith.constant 0 : index
      %c0_5 = arith.constant 0 : index
      %12 = vector.load %arg9[%c0, %c0_4, %c0_5] : memref<1x128x1xf32, #tpu.memory_space<vmem>>, vector<1x128x1xf32>
      tpu.vector_store %arg9[%c0, %c0_4, %c0_5], %11 {strides = array<i32>} : memref<1x128x1xf32, #tpu.memory_space<vmem>>, vector<1x128x1xf32>,
      %cst_6 = arith.constant 0.000000e+00 : f32
      %13 = vector.broadcast %cst_6 : f32 to vector<1x128x1xf32>
      %c0_7 = arith.constant 0 : index
      %c0_8 = arith.constant 0 : index
      %c0_9 = arith.constant 0 : index
      %14 = vector.load %arg10[%c0_7, %c0_8, %c0_9] : memref<1x128x1xf32, #tpu.memory_space<vmem>>, vector<1x128x1xf32>
      tpu.vector_store %arg10[%c0_7, %c0_8, %c0_9], %13 {strides = array<i32>} : memref<1x128x1xf32, #tpu.memory_space<vmem>>, vector<1x128x1xf32>,
      %cst_10 = arith.constant 0.000000e+00 : f32
      %15 = vector.broadcast %cst_10 : f32 to vector<1x128x32xf32>
      %c0_11 = arith.constant 0 : index
      %c0_12 = arith.constant 0 : index
      %c0_13 = arith.constant 0 : index
      %16 = vector.load %arg11[%c0_11, %c0_12, %c0_13] : memref<1x128x32xf32, #tpu.memory_space<vmem>>, vector<1x128x32xf32>
      tpu.vector_store %arg11[%c0_11, %c0_12, %c0_13], %15 {strides = array<i32>} : memref<1x128x32xf32, #tpu.memory_space<vmem>>, vector<1x128x32xf32>,
    } else {
    }
    %3 = arith.index_cast %arg0 : i32 to index
    %4 = memref.load %arg3[%3] : memref<2xi32, #tpu.memory_space<smem>>
    %5 = arith.cmpi sle, %arg2, %4 : i32
    %6 = arith.extui %5 : i1 to i32
    %c0_i32_1 = arith.constant 0 : i32
    %7 = arith.cmpi ne, %6, %c0_i32_1 : i32
    scf.if %7 {
      %c0 = arith.constant 0 : index
      %c0_4 = arith.constant 0 : index
      %c0_5 = arith.constant 0 : index
      %11 = vector.load %arg4[%c0, %c0_4, %c0_5] : memref<1x128x32xf32, #tpu.memory_space<vmem>>, vector<1x128x32xf32>
      %c0_6 = arith.constant 0 : index
      %c0_7 = arith.constant 0 : index
      %c0_8 = arith.constant 0 : index
      %12 = vector.load %arg5[%c0_6, %c0_7, %c0_8] : memref<1x128x32xf32, #tpu.memory_space<vmem>>, vector<1x128x32xf32>
      %cst = arith.constant dense<0.000000e+00> : vector<1x128x128xf32>
      %13 = tpu.matmul %11, %12, %cst {dimension_numbers = #tpu.dot_dimension_numbers<[2], [2], [1], [1], [0, 0, 0, 1, 1, 1], [0], [0]>} : vector<1x128x32xf32>, vector<1x128x32xf32>, vector<1x128x128xf32> -> vector<1x128x128xf32>
      %c0_9 = arith.constant 0 : index
      %c0_10 = arith.constant 0 : index
      %c0_11 = arith.constant 0 : index
      %14 = vector.load %arg7[%c0_9, %c0_10, %c0_11] : memref<1x1x128xf32, #tpu.memory_space<vmem>>, vector<1x1x128xf32>
      %15 = vector.broadcast %14 : vector<1x1x128xf32> to vector<1x128x128xf32>
      %16 = arith.addf %13, %15 : vector<1x128x128xf32>
      %c0_12 = arith.constant 0 : index
      %c0_13 = arith.constant 0 : index
      %c0_14 = arith.constant 0 : index
      %17 = vector.load %arg9[%c0_12, %c0_13, %c0_14] : memref<1x128x1xf32, #tpu.memory_space<vmem>>, vector<1x128x1xf32>
      %cst_15 = arith.constant dense<0xFF800000> : vector<1x128xf32>
      %18 = vector.multi_reduction <maximumf>, %16, %cst_15 [2] : vector<1x128x128xf32> to vector<1x128xf32>
      %19 = vector.shape_cast %18 : vector<1x128xf32> to vector<1x128x1xf32>
      %20 = arith.maximumf %17, %19 : vector<1x128x1xf32>
      %21 = arith.subf %17, %20 : vector<1x128x1xf32>
      %22 = math.exp %21 : vector<1x128x1xf32>
      %23 = vector.broadcast %20 : vector<1x128x1xf32> to vector<1x128x128xf32>
      %24 = arith.subf %16, %23 : vector<1x128x128xf32>
      %25 = math.exp %24 : vector<1x128x128xf32>
      %c0_16 = arith.constant 0 : index
      %c0_17 = arith.constant 0 : index
      %c0_18 = arith.constant 0 : index
      %26 = vector.load %arg10[%c0_16, %c0_17, %c0_18] : memref<1x128x1xf32, #tpu.memory_space<vmem>>, vector<1x128x1xf32>
      %27 = arith.mulf %22, %26 : vector<1x128x1xf32>
      %cst_19 = arith.constant dense<0.000000e+00> : vector<1x128xf32>
      %28 = vector.multi_reduction <add>, %25, %cst_19 [2] : vector<1x128x128xf32> to vector<1x128xf32>
      %29 = vector.shape_cast %28 : vector<1x128xf32> to vector<1x128x1xf32>
      %30 = arith.addf %27, %29 : vector<1x128x1xf32>
      %c0_20 = arith.constant 0 : index
      %c0_21 = arith.constant 0 : index
      %c0_22 = arith.constant 0 : index
      %31 = vector.load %arg10[%c0_20, %c0_21, %c0_22] : memref<1x128x1xf32, #tpu.memory_space<vmem>>, vector<1x128x1xf32>
      tpu.vector_store %arg10[%c0_20, %c0_21, %c0_22], %30 {strides = array<i32>} : memref<1x128x1xf32, #tpu.memory_space<vmem>>, vector<1x128x1xf32>,
      %c0_23 = arith.constant 0 : index
      %c0_24 = arith.constant 0 : index
      %c0_25 = arith.constant 0 : index
      %32 = vector.load %arg6[%c0_23, %c0_24, %c0_25] : memref<1x128x32xf32, #tpu.memory_space<vmem>>, vector<1x128x32xf32>
      %cst_26 = arith.constant dense<0.000000e+00> : vector<1x128x32xf32>
      %33 = tpu.matmul %25, %32, %cst_26 {dimension_numbers = #tpu.dot_dimension_numbers<[2], [1], [1], [2], [0, 0, 0, 1, 1, 2], [0], [0]>} : vector<1x128x128xf32>, vector<1x128x32xf32>, vector<1x128x32xf32> -> vector<1x128x32xf32>
      %c0_27 = arith.constant 0 : index
      %c0_28 = arith.constant 0 : index
      %c0_29 = arith.constant 0 : index
      %34 = vector.load %arg11[%c0_27, %c0_28, %c0_29] : memref<1x128x32xf32, #tpu.memory_space<vmem>>, vector<1x128x32xf32>
      %35 = vector.broadcast %22 : vector<1x128x1xf32> to vector<1x128x32xf32>
      %36 = arith.mulf %35, %34 : vector<1x128x32xf32>
      %37 = arith.addf %36, %33 : vector<1x128x32xf32>
      %c0_30 = arith.constant 0 : index
      %c0_31 = arith.constant 0 : index
      %c0_32 = arith.constant 0 : index
      %38 = vector.load %arg11[%c0_30, %c0_31, %c0_32] : memref<1x128x32xf32, #tpu.memory_space<vmem>>, vector<1x128x32xf32>
      tpu.vector_store %arg11[%c0_30, %c0_31, %c0_32], %37 {strides = array<i32>} : memref<1x128x32xf32, #tpu.memory_space<vmem>>, vector<1x128x32xf32>,
      %c0_33 = arith.constant 0 : index
      %c0_34 = arith.constant 0 : index
      %c0_35 = arith.constant 0 : index
      %39 = vector.load %arg9[%c0_33, %c0_34, %c0_35] : memref<1x128x1xf32, #tpu.memory_space<vmem>>, vector<1x128x1xf32>
      tpu.vector_store %arg9[%c0_33, %c0_34, %c0_35], %20 {strides = array<i32>} : memref<1x128x1xf32, #tpu.memory_space<vmem>>, vector<1x128x1xf32>,
    } else {
    }
    %c0_i32_2 = arith.constant 0 : i32
    %8 = arith.cmpi eq, %arg2, %c0_i32_2 : i32
    %9 = arith.extui %8 : i1 to i32
    %c0_i32_3 = arith.constant 0 : i32
    %10 = arith.cmpi ne, %9, %c0_i32_3 : i32
    scf.if %10 {
      %c0 = arith.constant 0 : index
      %c0_4 = arith.constant 0 : index
      %c0_5 = arith.constant 0 : index
      %11 = vector.load %arg11[%c0, %c0_4, %c0_5] : memref<1x128x32xf32, #tpu.memory_space<vmem>>, vector<1x128x32xf32>
      %c0_6 = arith.constant 0 : index
      %c0_7 = arith.constant 0 : index
      %c0_8 = arith.constant 0 : index
      %12 = vector.load %arg10[%c0_6, %c0_7, %c0_8] : memref<1x128x1xf32, #tpu.memory_space<vmem>>, vector<1x128x1xf32>
      %13 = vector.broadcast %12 : vector<1x128x1xf32> to vector<1x128x32xf32>
      %14 = arith.divf %11, %13 : vector<1x128x32xf32>
      %c0_9 = arith.constant 0 : index
      %c0_10 = arith.constant 0 : index
      %c0_11 = arith.constant 0 : index
      %15 = vector.load %arg8[%c0_9, %c0_10, %c0_11] : memref<1x128x32xf32, #tpu.memory_space<vmem>>, vector<1x128x32xf32>
      tpu.vector_store %arg8[%c0_9, %c0_10, %c0_11], %14 {strides = array<i32>} : memref<1x128x32xf32, #tpu.memory_space<vmem>>, vector<1x128x32xf32>,
    } else {
    }
    return
  }
  func.func @transform_0(%arg0: i32, %arg1: i32, %arg2: i32, %arg3: memref<2xi32, #tpu.memory_space<smem>>) -> (i32, i32, i32) {
    %c0_i32 = arith.constant 0 : i32
    %c0_i32_0 = arith.constant 0 : i32
    return %arg0, %arg1, %c0_i32 : i32, i32, i32
  }
  func.func @transform_1(%arg0: i32, %arg1: i32, %arg2: i32, %arg3: memref<2xi32, #tpu.memory_space<smem>>) -> (i32, i32, i32) {
    %0 = arith.index_cast %arg0 : i32 to index
    %1 = memref.load %arg3[%0] : memref<2xi32, #tpu.memory_space<smem>>
    %2 = arith.minsi %arg2, %1 : i32
    %c0_i32 = arith.constant 0 : i32
    %c0_i32_0 = arith.constant 0 : i32
    return %arg0, %2, %c0_i32 : i32, i32, i32
  }
  func.func @transform_2(%arg0: i32, %arg1: i32, %arg2: i32, %arg3: memref<2xi32, #tpu.memory_space<smem>>) -> (i32, i32, i32) {
    %0 = arith.index_cast %arg0 : i32 to index
    %1 = memref.load %arg3[%0] : memref<2xi32, #tpu.memory_space<smem>>
    %2 = arith.minsi %arg2, %1 : i32
    %c0_i32 = arith.constant 0 : i32
    %c0_i32_0 = arith.constant 0 : i32
    return %arg0, %2, %c0_i32 : i32, i32, i32
  }
  func.func @transform_3(%arg0: i32, %arg1: i32, %arg2: i32, %arg3: memref<2xi32, #tpu.memory_space<smem>>) -> (i32, i32, i32) {
    %0 = arith.index_cast %arg0 : i32 to index
    %1 = memref.load %arg3[%0] : memref<2xi32, #tpu.memory_space<smem>>
    %2 = arith.minsi %arg2, %1 : i32
    %c0_i32 = arith.constant 0 : i32
    %c0_i32_0 = arith.constant 0 : i32
    return %arg0, %c0_i32, %2 : i32, i32, i32
  }
  func.func @transform_4(%arg0: i32, %arg1: i32, %arg2: i32, %arg3: memref<2xi32, #tpu.memory_space<smem>>) -> (i32, i32, i32) {
    %c0_i32 = arith.constant 0 : i32
    %c0_i32_0 = arith.constant 0 : i32
    return %arg0, %arg1, %c0_i32 : i32, i32, i32
  }
}

</mosaic_0001>

<bundles_post_ra>
// kernel: tpu_custom_call.1
= control target key start
LH: loop header
LB: loop body
LE: loop exit
PB: predicated region body
PF: predicated region fallthrough
CT: control target
= control target key end

     0   :  { %s2745_s0 = inlined_call_operand.vmem [shape: s32[2], index: 0, kind: input, shape index: {}]   ;;  %s2746_s1 = inlined_call_operand.vmem [shape: f32[2,128,32], index: 1, kind: input, shape index: {}]   ;;  %s2747_s2 = inlined_call_operand.vmem [shape: f32[2,128,32], index: 2, kind: input, shape index: {}]   ;;  %s2748_s3 = inlined_call_operand.vmem [shape: f32[2,128,32], index: 3, kind: input, shape index: {}]   ;;  %s2749_s4 = inlined_call_operand.vmem [shape: f32[2,1,128], index: 4, kind: input, shape index: {}]   ;;  %s2750_s5 = inlined_call_operand.vmem [shape: f32[2,128,32], index: 5, kind: output, shape index: {}]  }
   0x1   :  { %s10_s20 = sshll.u32 %s2745_s0, 4  ;;  %s11_s20 = int_to_ptr.vmem [resolvable:$true] %s10_s20 }
   0x2   :  { %s2082_s21 = scalar_lea.vmem %s11_s20, 16  ;;  %p2087_p1 = scmp.lt.s32.totalorder %s11_s20, %s11_s20 }
   0x3   :  { %p2083_p0 = scmp.ne.s32.totalorder %s11_s20, %s2082_s21  ;;  %p2088_p2 = scmp.lt.s32.totalorder %s2082_s21, %s2082_s21 }
   0x5   :  { %p2089_p3 = por %p2088_p2, %p2087_p1 }
   0x7   :  { %p2090_p4 = pnand %p2089_p3, %p2083_p0 }
   0x9   :  { %2093 = shalt.err (!%p2090_p4)  }
   0xa   :  { %s2120_s22 = smov [#allocation6]  }
   0xb   :  { %13 = dma.vmem_to_smem %s11_s20, 16, %s2120_s22, [#allocation5] }
   0xc   :  { %2106 = dma.done.wait [#allocation5], 16 }
   0xd   :  { %2107 = vsyncadd [#allocation5], 4294967280 }
   0xe   :  { %15 = sfence }
   0xf   :  { %s2158_s23 = smov 0   ;;  %s2160_s24 = smov 0  }
  0x10   :  { %s2162_s25 = smov 0  }
  0x11 LB: > { %s40_s0 = sadd.s32 1, %s2114_s24  ;;  %p1721_p5 = scmp.ge.s32.totalorder %s2118_s25, 1  ;;  %s2118_s25 = sphi %s2162_s25, %s21_s25   ;;  %s2114_s24 = sphi %s2160_s24, %s2752_s24   ;;  %s2110_s23 = sphi %s2158_s23, %s2751_s23  }
  0x12   : > { %p42_p6 = scmp.ge.s32.totalorder %s40_s0, 2  ;;  %p280_p7 = scmp.lt.s32.totalorder %s2118_s25, 3 }
  0x14   : > { %s2754_s0 = smov (%p42_p6, %s40_s0), 0  ;;  %p281_p8 = pnand %p1721_p5, %p280_p7 }
  0x15   : > { %p348_p9 = scmp.lt.s32.totalorder (!%p281_p8), %s2110_s23, 1  ;;  %s2180_s26 = sld [smem:[#allocation6 + %s2110_s23]] (!%p281_p8) }
  0x16   : > { %284 = sbr.rel (%p281_p8) target bundleno = 1011 (0x3f3), region = 36  ;;  %s2183_s27 = sld [smem:[#allocation6 + %s2110_s23]] (!%p281_p8) }
  0x17   : > { %s389_s30 = sld [smem:[#allocation6 + %s2110_s23]] (!%p281_p8) }
  0x18   : > { %s465_s12 = sld [smem:[#allocation6 + %s2110_s23]] (!%p281_p8) }
  0x1b   : > { %vm415_vm0 = vcmask 7168   ;;  %v2121_v0 = vmov -1e+30   ;;  %v2122_v1 = vmov 0.0   ;;  %vm448_vm1 = vcmask 261120   ;;  %s2220_s28 = scalar_select %p348_p9, %s2110_s23, 1 }
  0x1c   : > { %416 = vst.msk [vmem:[#allocation2] sm:$0xff] %vm415_vm0, %v2121_v0  ;;  %417 = vst.msk [vmem:[#allocation2 + $0x8] sm:$0xff] %vm415_vm0, %v2121_v0  ;;  %p1724_p10 = scmp.gt.s32.totalorder %s2180_s26, 0  ;;  %p1728_p11 = scmp.gt.s32.totalorder %s2183_s27, 0 }
  0x1d   : > { %418 = vst.msk [vmem:[#allocation2 + $0x10] sm:$0xff] %vm415_vm0, %v2121_v0  ;;  %419 = vst.msk [vmem:[#allocation2 + $0x18] sm:$0xff] %vm415_vm0, %v2121_v0  ;;  %s1775_s29 = sshll.u32 %s2220_s28, 7  ;;  %s1726_s14 = sshll.u32 %s2220_s28, 4 }
  0x1e   : > { %420 = vst.msk [vmem:[#allocation2 + $0x20] sm:$0xff] %vm415_vm0, %v2121_v0  ;;  %421 = vst.msk [vmem:[#allocation2 + $0x28] sm:$0xff] %vm415_vm0, %v2121_v0  ;;  %s2243_s8 = scalar_lea.vmem %s2746_s1, %s1775_s29  ;;  %s2248_s11 = scalar_lea.vmem %s2750_s5, %s1775_s29 }
  0x1f   : > { %422 = vst.msk [vmem:[#allocation2 + $0x30] sm:$0xff] %vm415_vm0, %v2121_v0  ;;  %423 = vst.msk [vmem:[#allocation2 + $0x38] sm:$0xff] %vm415_vm0, %v2121_v0  ;;  %s2756_s26 = smov (%p1724_p10, %s2180_s26), 0  ;;  %s2758_s27 = smov (%p1728_p11, %s2183_s27), 0 }
  0x20   : > { %424 = vst.msk [vmem:[#allocation2 + $0x40] sm:$0xff] %vm415_vm0, %v2121_v0  ;;  %425 = vst.msk [vmem:[#allocation2 + $0x48] sm:$0xff] %vm415_vm0, %v2121_v0  ;;  %s1725_s13 = sshll.u32 %s2756_s26, 4  ;;  %s1729_s15 = sshll.u32 %s2758_s27, 4 }
  0x21   : > { %426 = vst.msk [vmem:[#allocation2 + $0x50] sm:$0xff] %vm415_vm0, %v2121_v0  ;;  %427 = vst.msk [vmem:[#allocation2 + $0x58] sm:$0xff] %vm415_vm0, %v2121_v0  ;;  %p363_p12 = scmp.lt.s32.totalorder %s1725_s13, 15  ;;  %p379_p13 = scmp.lt.s32.totalorder %s1729_s15, 15 }
  0x22   : > { %428 = vst.msk [vmem:[#allocation2 + $0x60] sm:$0xff] %vm415_vm0, %v2121_v0  ;;  %429 = vst.msk [vmem:[#allocation2 + $0x68] sm:$0xff] %vm415_vm0, %v2121_v0  ;;  %p1732_p0 = scmp.gt.s32.totalorder %s389_s30, 0  ;;  %p1734_p1 = scmp.lt.s32.totalorder %s389_s30, 0 }
  0x23   : > { %430 = vst.msk [vmem:[#allocation2 + $0x70] sm:$0xff] %vm415_vm0, %v2121_v0  ;;  %431 = vst.msk [vmem:[#allocation2 + $0x78] sm:$0xff] %vm415_vm0, %v2121_v0  ;;  %s2760_s13 = smov (!%p363_p12, %s1725_s13), 15  ;;  %s2762_s15 = smov (!%p379_p13, %s1729_s15), 15 }
  0x24   : > { %432 = vst.msk [vmem:[#allocation3] sm:$0xff] %vm415_vm0, %v2122_v1  ;;  %433 = vst.msk [vmem:[#allocation3 + $0x8] sm:$0xff] %vm415_vm0, %v2122_v1  ;;  %s366_s16 = sadd.s32 %s1726_s14, %s2760_s13  ;;  %s382_s18 = sadd.s32 %s1726_s14, %s2762_s15 }
  0x25   : > { %434 = vst.msk [vmem:[#allocation3 + $0x10] sm:$0xff] %vm415_vm0, %v2122_v1  ;;  %435 = vst.msk [vmem:[#allocation3 + $0x18] sm:$0xff] %vm415_vm0, %v2122_v1  ;;  %s1727_s17 = sshll.u32 %s366_s16, 3  ;;  %s1731_s22 = sshll.u32 %s382_s18, 3 }
  0x26   : > { %436 = vst.msk [vmem:[#allocation3 + $0x20] sm:$0xff] %vm415_vm0, %v2122_v1  ;;  %437 = vst.msk [vmem:[#allocation3 + $0x28] sm:$0xff] %vm415_vm0, %v2122_v1  ;;  %s2259_s21 = scalar_lea.vmem %s2747_s2, %s1727_s17  ;;  %s2264_s29 = scalar_lea.vmem %s2748_s3, %s1731_s22 }
  0x27   : > { %438 = vst.msk [vmem:[#allocation3 + $0x30] sm:$0xff] %vm415_vm0, %v2122_v1  ;;  %439 = vst.msk [vmem:[#allocation3 + $0x38] sm:$0xff] %vm415_vm0, %v2122_v1  ;;  %s2764_s30 = smov (%p1732_p0, %s389_s30), 0  ;;  %p1739_p2 = scmp.lt.s32.totalorder %s465_s12, 0 }
  0x28   : > { %440 = vst.msk [vmem:[#allocation3 + $0x40] sm:$0xff] %vm415_vm0, %v2122_v1  ;;  %441 = vst.msk [vmem:[#allocation3 + $0x48] sm:$0xff] %vm415_vm0, %v2122_v1  ;;  %s2766_s30 = smov (!%p1734_p1, %s2764_s30), 0 }
  0x29   : > { %442 = vst.msk [vmem:[#allocation3 + $0x50] sm:$0xff] %vm415_vm0, %v2122_v1  ;;  %443 = vst.msk [vmem:[#allocation3 + $0x58] sm:$0xff] %vm415_vm0, %v2122_v1  ;;  %s396_s27 = sadd.s32 %s2766_s30, %s2220_s28 }
  0x2a   : > { %444 = vst.msk [vmem:[#allocation3 + $0x60] sm:$0xff] %vm415_vm0, %v2122_v1  ;;  %445 = vst.msk [vmem:[#allocation3 + $0x68] sm:$0xff] %vm415_vm0, %v2122_v1  ;;  %s2270_s9 = scalar_lea.vmem %s2749_s4, %s396_s27 }
  0x2b   : > { %446 = vst.msk [vmem:[#allocation3 + $0x70] sm:$0xff] %vm415_vm0, %v2122_v1  ;;  %447 = vst.msk [vmem:[#allocation3 + $0x78] sm:$0xff] %vm415_vm0, %v2122_v1 }
  0x2c   : > { %449 = vst.msk [vmem:[#allocation4] sm:$0xff] %vm448_vm1, %v2122_v1  ;;  %450 = vst.msk [vmem:[#allocation4 + $0x8] sm:$0xff] %vm448_vm1, %v2122_v1 }
  0x2d   : > { %451 = vst.msk [vmem:[#allocation4 + $0x10] sm:$0xff] %vm448_vm1, %v2122_v1  ;;  %452 = vst.msk [vmem:[#allocation4 + $0x18] sm:$0xff] %vm448_vm1, %v2122_v1 }
  0x2e   : > { %453 = vst.msk [vmem:[#allocation4 + $0x20] sm:$0xff] %vm448_vm1, %v2122_v1  ;;  %454 = vst.msk [vmem:[#allocation4 + $0x28] sm:$0xff] %vm448_vm1, %v2122_v1 }
  0x2f   : > { %455 = vst.msk [vmem:[#allocation4 + $0x30] sm:$0xff] %vm448_vm1, %v2122_v1  ;;  %456 = vst.msk [vmem:[#allocation4 + $0x38] sm:$0xff] %vm448_vm1, %v2122_v1  ;;  %469 = sbr.rel (%p1739_p2) target bundleno = 839 (0x347), region = 44 }
  0x30   : > { %457 = vst.msk [vmem:[#allocation4 + $0x40] sm:$0xff] %vm448_vm1, %v2122_v1  ;;  %458 = vst.msk [vmem:[#allocation4 + $0x48] sm:$0xff] %vm448_vm1, %v2122_v1 }
  0x31   : > { %459 = vst.msk [vmem:[#allocation4 + $0x50] sm:$0xff] %vm448_vm1, %v2122_v1  ;;  %460 = vst.msk [vmem:[#allocation4 + $0x58] sm:$0xff] %vm448_vm1, %v2122_v1 }
  0x32   : > { %461 = vst.msk [vmem:[#allocation4 + $0x60] sm:$0xff] %vm448_vm1, %v2122_v1  ;;  %462 = vst.msk [vmem:[#allocation4 + $0x68] sm:$0xff] %vm448_vm1, %v2122_v1 }
  0x33   : > { %463 = vst.msk [vmem:[#allocation4 + $0x70] sm:$0xff] %vm448_vm1, %v2122_v1  ;;  %464 = vst.msk [vmem:[#allocation4 + $0x78] sm:$0xff] %vm448_vm1, %v2122_v1 }
  0x34   : > { %v501_v2 = vld [vmem:[%s2259_s21 + $0x78] sm:$0xff]  ;;  %v500_v3 = vld [vmem:[%s2259_s21 + $0x70] sm:$0xff]  ;;  %v499_v4 = vld [vmem:[%s2259_s21 + $0x68] sm:$0xff]  ;;  %v2123_v52 = vmov 0  }
  0x35   : > { %1841 = vmatprep.subr.msk.mxu0 %vm448_vm1, %v501_v2  ;;  %v470_v5 = vld [vmem:[%s2243_s8] sm:$0xff]  ;;  %v497_v7 = vld [vmem:[%s2259_s21 + $0x58] sm:$0xff]  ;;  %v496_v8 = vld [vmem:[%s2259_s21 + $0x50] sm:$0xff]  ;;  %1982 = vset.pattern.permute.xlu0 %v2123_v52 }
  0x36   : > { %1842 = vmatpush3.xpose.msk.msra.mxu0 %vm448_vm1, %v501_v2  ;;  %1873 = vmatprep.mubr.msk.f32.mxu0 %vm448_vm1, %v470_v5  ;;  %v498_v6 = vld [vmem:[%s2259_s21 + $0x60] sm:$0xff]  ;;  %v495_v9 = vld [vmem:[%s2259_s21 + $0x48] sm:$0xff]  ;;  %v493_v11 = vld [vmem:[%s2259_s21 + $0x38] sm:$0xff] }
  0x37   : > { %1843 = vmatprep.subr.msk.mxu0 %vm448_vm1, %v500_v3  ;;  %v494_v10 = vld [vmem:[%s2259_s21 + $0x40] sm:$0xff]  ;;  %v492_v12 = vld [vmem:[%s2259_s21 + $0x30] sm:$0xff]  ;;  %v491_v13 = vld [vmem:[%s2259_s21 + $0x28] sm:$0xff]  ;;  %1983 = vset.pattern.permute.xlu1 %v2123_v52 }
  0x38   : > { %v490_v14 = vld [vmem:[%s2259_s21 + $0x20] sm:$0xff]  ;;  %v489_v15 = vld [vmem:[%s2259_s21 + $0x18] sm:$0xff]  ;;  %v488_v16 = vld [vmem:[%s2259_s21 + $0x10] sm:$0xff] }
  0x39   : > { %v487_v17 = vld [vmem:[%s2259_s21 + $0x8] sm:$0xff]  ;;  %v486_v18 = vld [vmem:[%s2259_s21] sm:$0xff]  ;;  %v472_v20 = vld [vmem:[%s2243_s8 + $0x10] sm:$0xff] }
  0x3a   : > { %1844 = vmatpush3.xpose.msk.msra.mxu0 %vm448_vm1, %v500_v3  ;;  %v471_v19 = vld [vmem:[%s2243_s8 + $0x8] sm:$0xff]  ;;  %v473_v21 = vld [vmem:[%s2243_s8 + $0x18] sm:$0xff]  ;;  %v474_v22 = vld [vmem:[%s2243_s8 + $0x20] sm:$0xff] }
  0x3b   : > { %1845 = vmatprep.subr.msk.mxu0 %vm448_vm1, %v499_v4  ;;  %v475_v23 = vld [vmem:[%s2243_s8 + $0x28] sm:$0xff]  ;;  %v476_v24 = vld [vmem:[%s2243_s8 + $0x30] sm:$0xff]  ;;  %v477_v25 = vld [vmem:[%s2243_s8 + $0x38] sm:$0xff] }
  0x3c   : > { %v478_v26 = vld [vmem:[%s2243_s8 + $0x40] sm:$0xff]  ;;  %v479_v27 = vld [vmem:[%s2243_s8 + $0x48] sm:$0xff]  ;;  %v480_v28 = vld [vmem:[%s2243_s8 + $0x50] sm:$0xff] }
  0x3d   : > { %v481_v29 = vld [vmem:[%s2243_s8 + $0x58] sm:$0xff]  ;;  %v482_v30 = vld [vmem:[%s2243_s8 + $0x60] sm:$0xff]  ;;  %v483_v31 = vld [vmem:[%s2243_s8 + $0x68] sm:$0xff] }
  0x3e   : > { %1846 = vmatpush3.xpose.msk.msra.mxu0 %vm448_vm1, %v499_v4  ;;  %v484_v32 = vld [vmem:[%s2243_s8 + $0x70] sm:$0xff]  ;;  %v485_v33 = vld [vmem:[%s2243_s8 + $0x78] sm:$0xff]  ;;  %v1740_v35 = vld [vmem:[%s2270_s9] ss:$0 sm:$0xff] }
  0x3f   : > { %1847 = vmatprep.subr.msk.mxu0 %vm448_vm1, %v498_v6  ;;  %v1103_v4 = vld [vmem:[%s2264_s29 + $0x78] sm:$0xff]  ;;  %v1102_v5 = vld [vmem:[%s2264_s29 + $0x70] sm:$0xff]  ;;  %v2472_v52 = vld [vmem:[#allocation2 + $0x48] sm:$0xff] }
  0x40   : > { %1897 = vmatprep.subr.mxu1 %v1103_v4 }
  0x41   : > { %1898 = vmatpush3.msra.mxu1 %v1103_v4 }
  0x42   : > { %1848 = vmatpush3.xpose.msk.msra.mxu0 %vm448_vm1, %v498_v6  ;;  %v1101_v6 = vld [vmem:[%s2264_s29 + $0x68] sm:$0xff]  ;;  %1899 = vmatprep.subr.mxu1 %v1102_v5 }
  0x43   : > { %1849 = vmatprep.subr.msk.mxu0 %vm448_vm1, %v497_v7  ;;  %1900 = vmatpush3.msra.mxu1 %v1102_v5 }
  0x44   : > { %1901 = vmatprep.subr.mxu1 %v1101_v6 }
  0x45   : > { %1902 = vmatpush3.msra.mxu1 %v1101_v6  ;;  %v762_v6 = vld [vmem:[#allocation2 + $0x58] sm:$0xff] }
  0x46   : > { %1850 = vmatpush3.xpose.msk.msra.mxu0 %vm448_vm1, %v497_v7  ;;  %v1100_v7 = vld [vmem:[%s2264_s29 + $0x60] sm:$0xff] }
  0x47   : > { %1851 = vmatprep.subr.msk.mxu0 %vm448_vm1, %v496_v8  ;;  %1903 = vmatprep.subr.mxu1 %v1100_v7 }
  0x48   : > { %1904 = vmatpush3.msra.mxu1 %v1100_v7 }
  0x4a   : > { %1852 = vmatpush3.xpose.msk.msra.mxu0 %vm448_vm1, %v496_v8  ;;  %v1099_v8 = vld [vmem:[%s2264_s29 + $0x58] sm:$0xff] }
  0x4b   : > { %1853 = vmatprep.subr.msk.mxu0 %vm448_vm1, %v495_v9  ;;  %1905 = vmatprep.subr.mxu1 %v1099_v8 }
  0x4c   : > { %1906 = vmatpush3.msra.mxu1 %v1099_v8 }
  0x4e   : > { %1854 = vmatpush3.xpose.msk.msra.mxu0 %vm448_vm1, %v495_v9  ;;  %v2406_v9 = vld [vmem:[#allocation2] sm:$0xff] }
  0x4f   : > { %1855 = vmatprep.subr.msk.mxu0 %vm448_vm1, %v494_v10 }
  0x52   : > { %1856 = vmatpush3.xpose.msk.msra.mxu0 %vm448_vm1, %v494_v10  ;;  %v1098_v10 = vld [vmem:[%s2264_s29 + $0x50] sm:$0xff] }
  0x53   : > { %1857 = vmatprep.subr.msk.mxu0 %vm448_vm1, %v493_v11  ;;  %1907 = vmatprep.subr.mxu1 %v1098_v10 }
  0x54   : > { %1908 = vmatpush3.msra.mxu1 %v1098_v10 }
  0x56   : > { %1858 = vmatpush3.xpose.msk.msra.mxu0 %vm448_vm1, %v493_v11 }
  0x57   : > { %1859 = vmatprep.subr.msk.mxu0 %vm448_vm1, %v492_v12 }
  0x5a   : > { %1860 = vmatpush3.xpose.msk.msra.mxu0 %vm448_vm1, %v492_v12  ;;  %v2409_v12 = vld [vmem:[#allocation2 + $0x18] sm:$0xff] }
  0x5b   : > { %1861 = vmatprep.subr.msk.mxu0 %vm448_vm1, %v491_v13 }
  0x5e   : > { %1862 = vmatpush3.xpose.msk.msra.mxu0 %vm448_vm1, %v491_v13  ;;  %v1097_v13 = vld [vmem:[%s2264_s29 + $0x48] sm:$0xff] }
  0x5f   : > { %1863 = vmatprep.subr.msk.mxu0 %vm448_vm1, %v490_v14  ;;  %1909 = vmatprep.subr.mxu1 %v1097_v13 }
  0x60   : > { %1910 = vmatpush3.msra.mxu1 %v1097_v13 }
  0x62   : > { %1864 = vmatpush3.xpose.msk.msra.mxu0 %vm448_vm1, %v490_v14 }
  0x63   : > { %1865 = vmatprep.subr.msk.mxu0 %vm448_vm1, %v489_v15 }
  0x66   : > { %1866 = vmatpush3.xpose.msk.msra.mxu0 %vm448_vm1, %v489_v15 }
  0x67   : > { %1867 = vmatprep.subr.msk.mxu0 %vm448_vm1, %v488_v16 }
  0x6a   : > { %1868 = vmatpush3.xpose.msk.msra.mxu0 %vm448_vm1, %v488_v16  ;;  %v2415_v16 = vld [vmem:[#allocation2 + $0x8] sm:$0xff] }
  0x6b   : > { %1869 = vmatprep.subr.msk.mxu0 %vm448_vm1, %v487_v17 }
  0x6e   : > { %1870 = vmatpush3.xpose.msk.msra.mxu0 %vm448_vm1, %v487_v17  ;;  %v1096_v17 = vld [vmem:[%s2264_s29 + $0x40] sm:$0xff] }
  0x6f   : > { %1871 = vmatprep.subr.msk.mxu0 %vm448_vm1, %v486_v18  ;;  %1911 = vmatprep.subr.mxu1 %v1096_v17 }
  0x70   : > { %1912 = vmatpush3.msra.mxu1 %v1096_v17 }
  0x72   : > { %1872 = vmatpush3.xpose.msk.msra.mxu0 %vm448_vm1, %v486_v18 }
  0x75   : > { %1874 = vmatmul.mubr.msk.f32.vlgmr.msra.gmra.mxu0 %vm448_vm1, %v471_v19 }
  0x76   : > { %1876 = vmatprep.mubr.msk.f32.mxu0 %vm448_vm1, %v472_v20  ;;  %v2424_v20 = vld [vmem:[#allocation2 + $0x10] sm:$0xff] }
  0x79   : > { %1877 = vmatmul.mubr.msk.f32.gmra.mxu0 %vm448_vm1, %v473_v21  ;;  %v1095_v21 = vld [vmem:[%s2264_s29 + $0x38] sm:$0xff] }
  0x7a   : > { %1879 = vmatprep.mubr.msk.f32.mxu0 %vm448_vm1, %v474_v22  ;;  %1913 = vmatprep.subr.mxu1 %v1095_v21 }
  0x7b   : > { %1914 = vmatpush3.msra.mxu1 %v1095_v21  ;;  %v2501_v21 = vld [vmem:[#allocation2 + $0x70] sm:$0xff] }
  0x7d   : > { %1880 = vmatmul.mubr.msk.f32.gmra.mxu0 %vm448_vm1, %v475_v23 }
  0x7e   : > { %1882 = vmatprep.mubr.msk.f32.mxu0 %vm448_vm1, %v476_v24  ;;  %v2432_v24 = vld [vmem:[#allocation2 + $0x20] sm:$0xff] }
  0x81   : > { %1883 = vmatmul.mubr.msk.f32.gmra.mxu0 %vm448_vm1, %v477_v25  ;;  %v1094_v25 = vld [vmem:[%s2264_s29 + $0x30] sm:$0xff] }
  0x82   : > { %1885 = vmatprep.mubr.msk.f32.mxu0 %vm448_vm1, %v478_v26  ;;  %1915 = vmatprep.subr.mxu1 %v1094_v25 }
  0x83   : > { %1916 = vmatpush3.msra.mxu1 %v1094_v25 }
  0x85   : > { %1886 = vmatmul.mubr.msk.f32.gmra.mxu0 %vm448_vm1, %v479_v27  ;;  %v2441_v27 = vld [vmem:[#allocation2 + $0x28] sm:$0xff] }
  0x86   : > { %1888 = vmatprep.mubr.msk.f32.mxu0 %vm448_vm1, %v480_v28 }
  0x89   : > { %1889 = vmatmul.mubr.msk.f32.gmra.mxu0 %vm448_vm1, %v481_v29  ;;  %v1093_v29 = vld [vmem:[%s2264_s29 + $0x28] sm:$0xff] }
  0x8a   : > { %1891 = vmatprep.mubr.msk.f32.mxu0 %vm448_vm1, %v482_v30  ;;  %1917 = vmatprep.subr.mxu1 %v1093_v29 }
  0x8b   : > { %1918 = vmatpush3.msra.mxu1 %v1093_v29 }
  0x8d   : > { %1892 = vmatmul.mubr.msk.f32.gmra.mxu0 %vm448_vm1, %v483_v31 }
  0x8e   : > { %1894 = vmatprep.mubr.msk.f32.mxu0 %vm448_vm1, %v484_v32  ;;  %v2449_v32 = vld [vmem:[#allocation2 + $0x30] sm:$0xff] }
  0x91   : > { %1895 = vmatmul.mubr.msk.f32.gmra.mxu0 %vm448_vm1, %v485_v33  ;;  %v1092_v33 = vld [vmem:[%s2264_s29 + $0x20] sm:$0xff] }
  0x92   : > { %1919 = vmatprep.subr.mxu1 %v1092_v33 }
  0x93   : > { %1920 = vmatpush3.msra.mxu1 %v1092_v33 }
 0x135   : > { %v1875_v34 = vpop.f32.mrf.mxu0 }
 0x136   : > { %v2358_v41 = vadd.f32 %v1875_v34, %v1740_v35 }
 0x137   : > { %v672_v36 = vpop.f32.mrf.mxu0 }
 0x138   : > { %v2353_v37 = vadd.f32 %v1740_v35, %v672_v36 }
 0x139   : > { %v1878_v38 = vpop.f32.mrf.mxu0 }
 0x13a   : > { %v2355_v39 = vadd.f32 %v1878_v38, %v1740_v35  ;;  %767 = vmax.xlane.f32.xlu0 %v2353_v37  ;;  %v1091_v38 = vld [vmem:[%s2264_s29 + $0x18] sm:$0xff] }
 0x13b   : > { %v682_v40 = vpop.f32.mrf.mxu0  ;;  %1921 = vmatprep.subr.mxu1 %v1091_v38 }
 0x13c   : > { %773 = vmax.xlane.f32.xlu1 %v2355_v39  ;;  %v2361_v42 = vadd.f32 %v1740_v35, %v682_v40  ;;  %1922 = vmatpush3.msra.mxu1 %v1091_v38 }
 0x13d   : > { %v1881_v43 = vpop.f32.mrf.mxu0 }
 0x13e   : > { %769 = vmax.xlane.f32.xlu0 %v2358_v41  ;;  %v2365_v45 = vadd.f32 %v1881_v43, %v1740_v35 }
 0x13f   : > { %v692_v44 = vpop.f32.mrf.mxu0 }
 0x140   : > { %771 = vmax.xlane.f32.xlu1 %v2361_v42  ;;  %v2367_v46 = vadd.f32 %v1740_v35, %v692_v44  ;;  %v2463_v44 = vld [vmem:[#allocation2 + $0x40] sm:$0xff] }
 0x141   : > { %v1884_v47 = vpop.f32.mrf.mxu0 }
 0x142   : > { %775 = vmax.xlane.f32.xlu0 %v2367_v46  ;;  %v2371_v49 = vadd.f32 %v1884_v47, %v1740_v35  ;;  %v1090_v47 = vld [vmem:[%s2264_s29 + $0x10] sm:$0xff] }
 0x143   : > { %v702_v48 = vpop.f32.mrf.mxu0  ;;  %1923 = vmatprep.subr.mxu1 %v1090_v47 }
 0x144   : > { %777 = vmax.xlane.f32.xlu1 %v2365_v45  ;;  %v2373_v50 = vadd.f32 %v1740_v35, %v702_v48  ;;  %1924 = vmatpush3.msra.mxu1 %v1090_v47 }
 0x145   : > { %v1887_v51 = vpop.f32.mrf.mxu0 }
 0x146   : > { %779 = vmax.xlane.f32.xlu0 %v2373_v50  ;;  %v2377_v54 = vadd.f32 %v1887_v51, %v1740_v35 }
 0x147   : > { %v712_v53 = vpop.f32.mrf.mxu0 }
 0x148   : > { %781 = vmax.xlane.f32.xlu1 %v2371_v49  ;;  %v2379_v55 = vadd.f32 %v1740_v35, %v712_v53 }
 0x149   : > { %v1890_v56 = vpop.f32.mrf.mxu0 }
 0x14a   : > { %783 = vmax.xlane.f32.xlu0 %v2379_v55  ;;  %v2383_v58 = vadd.f32 %v1890_v56, %v1740_v35  ;;  %v1089_v56 = vld [vmem:[%s2264_s29 + $0x8] sm:$0xff] }
 0x14b   : > { %v722_v57 = vpop.f32.mrf.mxu0  ;;  %1925 = vmatprep.subr.mxu1 %v1089_v56 }
 0x14c   : > { %785 = vmax.xlane.f32.xlu1 %v2377_v54  ;;  %v2385_v59 = vadd.f32 %v1740_v35, %v722_v57  ;;  %1926 = vmatpush3.msra.mxu1 %v1089_v56 }
 0x14d   : > { %v1893_v60 = vpop.f32.mrf.mxu0 }
 0x14e   : > { %787 = vmax.xlane.f32.xlu0 %v2385_v59  ;;  %v2389_v62 = vadd.f32 %v1893_v60, %v1740_v35 }
 0x14f   : > { %v732_v61 = vpop.f32.mrf.mxu0 }
 0x150   : > { %789 = vmax.xlane.f32.xlu1 %v2383_v58  ;;  %v2391_v63 = vadd.f32 %v1740_v35, %v732_v61  ;;  %v2479_v61 = vld [vmem:[#allocation2 + $0x50] sm:$0xff] }
 0x151   : > { %v1896_v0 = vpop.f32.mrf.mxu0 }
 0x152   : > { %791 = vmax.xlane.f32.xlu0 %v2391_v63  ;;  %v2395_v2 = vadd.f32 %v1896_v0, %v1740_v35  ;;  %v1088_v0 = vld [vmem:[%s2264_s29] sm:$0xff] }
 0x153   : > { %v742_v1 = vpop.f32.mrf.mxu0  ;;  %1927 = vmatprep.subr.mxu1 %v1088_v0 }
 0x154   : > { %793 = vmax.xlane.f32.xlu1 %v2389_v62  ;;  %v2397_v3 = vadd.f32 %v1740_v35, %v742_v1  ;;  %v2456_v35 = vld [vmem:[#allocation2 + $0x38] sm:$0xff]  ;;  %1928 = vmatpush3.msra.mxu1 %v1088_v0 }
 0x156   : > { %795 = vmax.xlane.f32.xlu0 %v2397_v3 }
 0x158   : > { %797 = vmax.xlane.f32.xlu1 %v2395_v2 }
 0x1c3   : > { %v768_v11 = vpop.xlane.xlu0 %767 }
 0x1c4   : > { %v2413_v14 = vmax.f32 %v2406_v9, %v768_v11  ;;  %v2492_v11 = vld [vmem:[#allocation2 + $0x60] sm:$0xff] }
 0x1c5   : > { %v774_v15 = vpop.xlane.xlu1 %773 }
 0x1c6   : > { %1393 = vst.msk [vmem:[#allocation2] sm:$0xff] %vm415_vm0, %v2413_v14  ;;  %v2421_v18 = vmax.f32 %v2409_v12, %v774_v15  ;;  %865 = vperm.xlu0 %1982, %v2413_v14   ;;  %v815_v48 = vsub.f32 %v2406_v9, %v2413_v14  ;;  %v764_v14 = vld [vmem:[#allocation2 + $0x68] sm:$0xff] }
 0x1c7   : > { %v770_v19 = vpop.xlane.xlu0 %769 }
 0x1c8   : > { %1396 = vst.msk [vmem:[#allocation2 + $0x18] sm:$0xff] %vm415_vm0, %v2421_v18  ;;  %v2430_v22 = vmax.f32 %v2415_v16, %v770_v19  ;;  %v831_v1 = vmul.f32 1.442695, %v815_v48  ;;  %v818_v4 = vsub.f32 %v2409_v12, %v2421_v18 }
 0x1c9   : > { %v772_v23 = vpop.xlane.xlu1 %771 }
 0x1ca   : > { %1394 = vst.msk [vmem:[#allocation2 + $0x8] sm:$0xff] %vm415_vm0, %v2430_v22  ;;  %v2438_v26 = vmax.f32 %v2424_v20, %v772_v23  ;;  %870 = vperm.xlu1 %1983, %v2430_v22   ;;  %1984 = vpow2.f32 %v831_v1  ;;  %v837_v12 = vmul.f32 1.442695, %v818_v4  ;;  %v816_v29 = vsub.f32 %v2415_v16, %v2430_v22 }
 0x1cb   : > { %v776_v28 = vpop.xlane.xlu0 %775 }
 0x1cc   : > { %1395 = vst.msk [vmem:[#allocation2 + $0x10] sm:$0xff] %vm415_vm0, %v2438_v26  ;;  %v2447_v30 = vmax.f32 %v2432_v24, %v776_v28  ;;  %1986 = vpow2.f32 %v837_v12  ;;  %v833_v16 = vmul.f32 1.442695, %v816_v29  ;;  %v817_v22 = vsub.f32 %v2424_v20, %v2438_v26 }
 0x1cd   : > { %v778_v31 = vpop.xlane.xlu1 %777 }
 0x1ce   : > { %v804_v34 = vmax.f32 %v2441_v27, %v778_v31  ;;  %880 = vperm.xlu1 %1983, %v2421_v18   ;;  %1397 = vst.msk [vmem:[#allocation2 + $0x20] sm:$0xff] %vm415_vm0, %v2447_v30  ;;  %v819_v20 = vsub.f32 %v2432_v24, %v2447_v30 }
 0x1cf   : > { %v780_v36 = vpop.xlane.xlu0 %779 }
 0x1d0   : > { %1398 = vst.msk [vmem:[#allocation2 + $0x28] sm:$0xff] %vm415_vm0, %v804_v34  ;;  %v2461_v40 = vmax.f32 %v2449_v32, %v780_v36  ;;  %v820_v9 = vsub.f32 %v2441_v27, %v804_v34  ;;  %v2506_v27 = vld [vmem:[#allocation2 + $0x78] sm:$0xff] }
 0x1d1   : > { %v782_v43 = vpop.xlane.xlu1 %781 }
 0x1d2   : > { %v806_v51 = vmax.f32 %v2456_v35, %v782_v43  ;;  %875 = vperm.xlu1 %1983, %v2438_v26   ;;  %1399 = vst.msk [vmem:[#allocation2 + $0x30] sm:$0xff] %vm415_vm0, %v2461_v40  ;;  %v841_v18 = vmul.f32 1.442695, %v820_v9  ;;  %v821_v0 = vsub.f32 %v2449_v32, %v2461_v40 }
 0x1d3   : > { %v784_v53 = vpop.xlane.xlu0 %783 }
 0x1d4   : > { %1400 = vst.msk [vmem:[#allocation2 + $0x38] sm:$0xff] %vm415_vm0, %v806_v51  ;;  %v2477_v57 = vmax.f32 %v2463_v44, %v784_v53  ;;  %v822_v23 = vsub.f32 %v2456_v35, %v806_v51  ;;  %1988 = vpow2.f32 %v841_v18 }
 0x1d5   : > { %v786_v60 = vpop.xlane.xlu1 %785 }
 0x1d6   : > { %v808_v5 = vmax.f32 %v2472_v52, %v786_v60  ;;  %890 = vperm.xlu1 %1983, %v804_v34   ;;  %1401 = vst.msk [vmem:[#allocation2 + $0x40] sm:$0xff] %vm415_vm0, %v2477_v57  ;;  %v845_v34 = vmul.f32 1.442695, %v822_v23  ;;  %v839_v60 = vmul.f32 1.442695, %v819_v20  ;;  %v823_v4 = vsub.f32 %v2463_v44, %v2477_v57 }
 0x1d7   : > { %v788_v7 = vpop.xlane.xlu0 %787 }
 0x1d8   : > { %1402 = vst.msk [vmem:[#allocation2 + $0x48] sm:$0xff] %vm415_vm0, %v808_v5  ;;  %910 = vperm.xlu0 %1982, %v808_v5   ;;  %v2489_v8 = vmax.f32 %v2479_v61, %v788_v7  ;;  %v824_v35 = vsub.f32 %v2472_v52, %v808_v5  ;;  %1990 = vpow2.f32 %v845_v34  ;;  %v835_v52 = vmul.f32 1.442695, %v817_v22 }
 0x1d9   : > { %v790_v10 = vpop.xlane.xlu1 %789  ;;  %1992 = vpow2.f32 %v833_v16  ;;  %v847_v32 = vmul.f32 1.442695, %v823_v4 }
 0x1da   : > { %v810_v13 = vmax.f32 %v762_v6, %v790_v10  ;;  %885 = vperm.xlu1 %1983, %v2447_v30   ;;  %1403 = vst.msk [vmem:[#allocation2 + $0x50] sm:$0xff] %vm415_vm0, %v2489_v8  ;;  %v849_v47 = vmul.f32 1.442695, %v824_v35  ;;  %v843_v30 = vmul.f32 1.442695, %v821_v0 }
 0x1db   : > { %v792_v15 = vpop.xlane.xlu0 %791 }
 0x1dc   : > { %1404 = vst.msk [vmem:[#allocation2 + $0x58] sm:$0xff] %vm415_vm0, %v810_v13  ;;  %920 = vperm.xlu0 %1982, %v810_v13   ;;  %v2499_v17 = vmax.f32 %v2492_v11, %v792_v15  ;;  %v826_v48 = vsub.f32 %v762_v6, %v810_v13  ;;  %1994 = vpow2.f32 %v849_v47 }
 0x1dd   : > { %v794_v19 = vpop.xlane.xlu1 %793  ;;  %1996 = vpow2.f32 %v835_v52 }
 0x1de   : > { %v812_v25 = vmax.f32 %v764_v14, %v794_v19  ;;  %900 = vperm.xlu1 %1983, %v806_v51   ;;  %1405 = vst.msk [vmem:[#allocation2 + $0x60] sm:$0xff] %vm415_vm0, %v2499_v17  ;;  %v2531_v51 = vpop.eup %1984  ;;  %v853_v26 = vmul.f32 1.442695, %v826_v48 }
 0x1df   : > { %v796_v28 = vpop.xlane.xlu0 %795  ;;  %v2537_v56 = vpop.eup %1986 }
 0x1e0   : > { %1406 = vst.msk [vmem:[#allocation2 + $0x68] sm:$0xff] %vm415_vm0, %v812_v25  ;;  %930 = vperm.xlu0 %1982, %v812_v25   ;;  %v2512_v31 = vmax.f32 %v2501_v21, %v796_v28  ;;  %v828_v53 = vsub.f32 %v764_v14, %v812_v25  ;;  %1998 = vpow2.f32 %v853_v26 }
 0x1e1   : > { %v798_v33 = vpop.xlane.xlu1 %797  ;;  %v2542_v1 = vpop.eup %1988  ;;  %2000 = vpow2.f32 %v839_v60 }
 0x1e2   : > { %v2516_v36 = vmax.f32 %v2506_v27, %v798_v33  ;;  %895 = vperm.xlu1 %1983, %v2461_v40   ;;  %v829_v38 = vsub.f32 %v2501_v21, %v2512_v31  ;;  %1407 = vst.msk [vmem:[#allocation2 + $0x70] sm:$0xff] %vm415_vm0, %v2512_v31  ;;  %v857_v24 = vmul.f32 1.442695, %v828_v53  ;;  %v825_v40 = vsub.f32 %v2479_v61, %v2489_v8 }
 0x1e4   : > { %v830_v43 = vsub.f32 %v2506_v27, %v2516_v36  ;;  %1408 = vst.msk [vmem:[#allocation2 + $0x78] sm:$0xff] %vm415_vm0, %v2516_v36  ;;  %940 = vperm.xlu0 %1982, %v2516_v36   ;;  %2002 = vpow2.f32 %v857_v24  ;;  %v851_v44 = vmul.f32 1.442695, %v825_v40 }
 0x1e5   : > { %v2549_v5 = vpop.eup %1990  ;;  %2004 = vpow2.f32 %v843_v30 }
 0x1e6   : > { %905 = vperm.xlu1 %1983, %v2477_v57   ;;  %v2554_v6 = vpop.eup %1992  ;;  %2006 = vpow2.f32 %v847_v32  ;;  %v827_v57 = vsub.f32 %v2492_v11, %v2499_v17 }
 0x1e7   : > { %2008 = vpow2.f32 %v851_v44 }
 0x1e8   : > { %1267 = vperm.xlu0 %1982, %v2531_v51  }
 0x1e9   : > { %v2557_v7 = vpop.eup %1994 }
 0x1ea   : > { %915 = vperm.xlu1 %1983, %v2489_v8   ;;  %v2562_v9 = vpop.eup %1996  ;;  %v855_v8 = vmul.f32 1.442695, %v827_v57 }
 0x1ec   : > { %1282 = vperm.xlu0 %1982, %v2537_v56   ;;  %2010 = vpow2.f32 %v855_v8 }
 0x1ed   : > { %v2565_v61 = vpop.eup %1998 }
 0x1ee   : > { %925 = vperm.xlu1 %1983, %v2499_v17   ;;  %v2568_v10 = vpop.eup %2000 }
 0x1f0   : > { %1292 = vperm.xlu0 %1982, %v2542_v1  }
 0x1f1   : > { %v2571_v12 = vpop.eup %2002 }
 0x1f2   : > { %935 = vperm.xlu1 %1983, %v2512_v31   ;;  %v2574_v11 = vpop.eup %2004 }
 0x1f3   : > { %v2577_v13 = vpop.eup %2006 }
 0x1f4   : > { %1302 = vperm.xlu0 %1982, %v2549_v5   ;;  %v2580_v14 = vpop.eup %2008 }
 0x1f6   : > { %1272 = vperm.xlu1 %1983, %v2554_v6  }
 0x1f8   : > { %1312 = vperm.xlu0 %1982, %v2557_v7  }
 0x1f9   : > { %v2583_v15 = vpop.eup %2010 }
 0x1fa   : > { %1277 = vperm.xlu1 %1983, %v2562_v9  }
 0x1fc   : > { %1322 = vperm.xlu0 %1982, %v2565_v61  }
 0x1fe   : > { %1287 = vperm.xlu1 %1983, %v2568_v10  }
 0x200   : > { %1332 = vperm.xlu0 %1982, %v2571_v12  }
 0x202   : > { %1297 = vperm.xlu1 %1983, %v2574_v11  }
 0x206   : > { %1307 = vperm.xlu1 %1983, %v2577_v13  }
 0x20a   : > { %1317 = vperm.xlu1 %1983, %v2580_v14  }
 0x20e   : > { %1327 = vperm.xlu1 %1983, %v2583_v15  }
 0x241   : > { %v866_v17 = vpop.permute.xlu0 %865 }
 0x242   : > { %v943_v18 = vsub.f32 %v2353_v37, %v866_v17 }
 0x244   : > { %v959_v19 = vmul.f32 1.442695, %v943_v18 }
 0x245   : > { %v871_v23 = vpop.permute.xlu1 %870 }
 0x246   : > { %2012 = vpow2.f32 %v959_v19  ;;  %v944_v25 = vsub.f32 %v2358_v41, %v871_v23 }
 0x248   : > { %v961_v28 = vmul.f32 1.442695, %v944_v25 }
 0x249   : > { %v881_v29 = vpop.permute.xlu1 %880 }
 0x24a   : > { %2014 = vpow2.f32 %v961_v28  ;;  %v946_v33 = vsub.f32 %v2355_v39, %v881_v29 }
 0x24c   : > { %v965_v34 = vmul.f32 1.442695, %v946_v33 }
 0x24d   : > { %v876_v35 = vpop.permute.xlu1 %875 }
 0x24e   : > { %2016 = vpow2.f32 %v965_v34  ;;  %v945_v16 = vsub.f32 %v2361_v42, %v876_v35 }
 0x250   : > { %v963_v22 = vmul.f32 1.442695, %v945_v16 }
 0x251   : > { %v891_v47 = vpop.permute.xlu1 %890 }
 0x252   : > { %2018 = vpow2.f32 %v963_v22  ;;  %v948_v37 = vsub.f32 %v2365_v45, %v891_v47 }
 0x253   : > { %v2013_v48 = vpop.eup %2012  ;;  %v911_v52 = vpop.permute.xlu0 %910 }
 0x254   : > { %v969_v20 = vmul.f32 1.442695, %v948_v37  ;;  %1023 = vadd.xlane.f32.xlu1 %v2013_v48  ;;  %1929 = vmatprep.mubr.f32.mxu1 %v2013_v48  ;;  %v952_v45 = vsub.f32 %v2377_v54, %v911_v52 }
 0x255   : > { %v886_v41 = vpop.permute.xlu1 %885 }
 0x256   : > { %2020 = vpow2.f32 %v969_v20  ;;  %v947_v26 = vsub.f32 %v2367_v46, %v886_v41  ;;  %v977_v44 = vmul.f32 1.442695, %v952_v45 }
 0x257   : > { %v2015_v39 = vpop.eup %2014  ;;  %v921_v60 = vpop.permute.xlu0 %920 }
 0x258   : > { %v967_v53 = vmul.f32 1.442695, %v947_v26  ;;  %1025 = vadd.xlane.f32.xlu0 %v2015_v39  ;;  %1930 = vmatmul.mubr.f32.vlgmr.msra.gmra.mxu1 %v2015_v39  ;;  %v954_v57 = vsub.f32 %v2383_v58, %v921_v60  ;;  %v859_v39 = vmul.f32 1.442695, %v829_v38  ;;  %v861_v60 = vmul.f32 1.442695, %v830_v43 }
 0x259   : > { %v901_v42 = vpop.permute.xlu1 %900 }
 0x25a   : > { %2022 = vpow2.f32 %v967_v53  ;;  %v950_v0 = vsub.f32 %v2371_v49, %v901_v42  ;;  %v981_v18 = vmul.f32 1.442695, %v954_v57 }
 0x25b   : > { %v2017_v24 = vpop.eup %2016  ;;  %v931_v32 = vpop.permute.xlu0 %930 }
 0x25c   : > { %v973_v30 = vmul.f32 1.442695, %v950_v0  ;;  %1029 = vadd.xlane.f32.xlu1 %v2017_v24  ;;  %v956_v19 = vsub.f32 %v2389_v62, %v931_v32 }
 0x25d   : > { %v896_v4 = vpop.permute.xlu1 %895 }
 0x25e   : > { %2024 = vpow2.f32 %v973_v30  ;;  %v949_v40 = vsub.f32 %v2373_v50, %v896_v4  ;;  %v985_v29 = vmul.f32 1.442695, %v956_v19 }
 0x25f   : > { %v2019_v46 = vpop.eup %2018  ;;  %v941_v23 = vpop.permute.xlu0 %940 }
 0x260   : > { %v971_v8 = vmul.f32 1.442695, %v949_v40  ;;  %1027 = vadd.xlane.f32.xlu0 %v2019_v46  ;;  %1932 = vmatprep.mubr.f32.mxu1 %v2019_v46  ;;  %v958_v33 = vsub.f32 %v2395_v2, %v941_v23  ;;  %v994_v23 = vld [vmem:[#allocation3 + $0x18] sm:$0xff] }
 0x261   : > { %v906_v17 = vpop.permute.xlu1 %905  ;;  %1933 = vmatmul.mubr.f32.gmra.mxu1 %v2017_v24 }
 0x262   : > { %2026 = vpow2.f32 %v971_v8  ;;  %v951_v49 = vsub.f32 %v2379_v55, %v906_v17  ;;  %v989_v16 = vmul.f32 1.442695, %v958_v33 }
 0x263   : > { %v2021_v54 = vpop.eup %2020  ;;  %2028 = vpow2.f32 %v977_v44  ;;  %v2616_v38 = vpop.permute.xlu0 %1267  ;;  %v991_v44 = vld [vmem:[#allocation3] sm:$0xff] }
 0x264   : > { %v975_v25 = vmul.f32 1.442695, %v951_v49  ;;  %1033 = vadd.xlane.f32.xlu1 %v2021_v54  ;;  %v1007_v57 = vmul.f32 %v2531_v51, %v991_v44  ;;  %v992_v49 = vld [vmem:[#allocation3 + $0x8] sm:$0xff]  ;;  %v1001_v44 = vld [vmem:[#allocation3 + $0x50] sm:$0xff] }
 0x265   : > { %v916_v50 = vpop.permute.xlu1 %915 }
 0x266   : > { %2030 = vpow2.f32 %v975_v25  ;;  %v953_v58 = vsub.f32 %v2385_v59, %v916_v50  ;;  %v1010_v50 = vmul.f32 %v2537_v56, %v994_v23 }
 0x267   : > { %v2023_v28 = vpop.eup %2022  ;;  %2032 = vpow2.f32 %v981_v18  ;;  %v2620_v24 = vpop.permute.xlu0 %1282  ;;  %v1008_v18 = vmul.f32 %v2554_v6, %v992_v49  ;;  %v1017_v49 = vmul.f32 %v2580_v14, %v1001_v44  ;;  %v1005_v14 = vld [vmem:[#allocation3 + $0x70] sm:$0xff] }
 0x268   : > { %v979_v34 = vmul.f32 1.442695, %v953_v58  ;;  %1031 = vadd.xlane.f32.xlu0 %v2023_v28  ;;  %1935 = vmatprep.mubr.f32.mxu1 %v2023_v28  ;;  %v993_v28 = vld [vmem:[#allocation3 + $0x10] sm:$0xff] }
 0x269   : > { %v926_v55 = vpop.permute.xlu1 %925  ;;  %1936 = vmatmul.mubr.f32.gmra.mxu1 %v2021_v54  ;;  %v1009_v51 = vmul.f32 %v2562_v9, %v993_v28 }
 0x26a   : > { %2034 = vpow2.f32 %v979_v34  ;;  %v955_v62 = vsub.f32 %v2391_v63, %v926_v55  ;;  %v996_v34 = vld [vmem:[#allocation3 + $0x28] sm:$0xff] }
 0x26b   : > { %v2025_v35 = vpop.eup %2024  ;;  %2036 = vpow2.f32 %v985_v29  ;;  %v2624_v27 = vpop.permute.xlu0 %1292  ;;  %v1012_v6 = vmul.f32 %v2542_v1, %v996_v34 }
 0x26c   : > { %v983_v22 = vmul.f32 1.442695, %v955_v62  ;;  %1037 = vadd.xlane.f32.xlu1 %v2025_v35 }
 0x26d   : > { %v936_v47 = vpop.permute.xlu1 %935 }
 0x26e   : > { %2038 = vpow2.f32 %v983_v22  ;;  %v957_v59 = vsub.f32 %v2397_v3, %v936_v47  ;;  %v998_v47 = vld [vmem:[#allocation3 + $0x38] sm:$0xff] }
 0x26f   : > { %v2027_v37 = vpop.eup %2026  ;;  %2040 = vpow2.f32 %v989_v16  ;;  %v2628_v43 = vpop.permute.xlu0 %1302  ;;  %v1014_v9 = vmul.f32 %v2549_v5, %v998_v47  ;;  %v1252_v47 = vld [vmem:[#allocation4 + $0x18] sm:$0xff] }
 0x270   : > { %v2029_v2 = vpop.eup %2028  ;;  %v987_v48 = vmul.f32 1.442695, %v957_v59  ;;  %1035 = vadd.xlane.f32.xlu0 %v2027_v37  ;;  %1938 = vmatprep.mubr.f32.mxu1 %v2027_v37 }
 0x271   : > { %1041 = vadd.xlane.f32.xlu1 %v2029_v2  ;;  %1939 = vmatmul.mubr.f32.gmra.mxu1 %v2025_v35  ;;  %v2614_v31 = vpop.permute.xlu1 %1272  ;;  %v995_v35 = vld [vmem:[#allocation3 + $0x20] sm:$0xff] }
 0x272   : > { %2042 = vpow2.f32 %v987_v48  ;;  %v1011_v56 = vmul.f32 %v2568_v10, %v995_v35 }
 0x273   : > { %v2031_v52 = vpop.eup %2030  ;;  %2044 = vpow2.f32 %v859_v39  ;;  %v2632_v4 = vpop.permute.xlu0 %1312 }
 0x274   : > { %v2033_v63 = vpop.eup %2032  ;;  %1039 = vadd.xlane.f32.xlu0 %v2031_v52  ;;  %1941 = vmatprep.mubr.f32.mxu1 %v2031_v52  ;;  %2046 = vpow2.f32 %v861_v60  ;;  %v1000_v52 = vld [vmem:[#allocation3 + $0x48] sm:$0xff] }
 0x275   : > { %1045 = vadd.xlane.f32.xlu1 %v2033_v63  ;;  %1942 = vmatmul.mubr.f32.gmra.mxu1 %v2029_v2  ;;  %v2618_v0 = vpop.permute.xlu1 %1277  ;;  %v997_v2 = vld [vmem:[#allocation3 + $0x30] sm:$0xff] }
 0x276   : > { %v1013_v1 = vmul.f32 %v2574_v11, %v997_v2 }
 0x277   : > { %v2035_v20 = vpop.eup %2034  ;;  %v2636_v40 = vpop.permute.xlu0 %1322 }
 0x278   : > { %v2037_v41 = vpop.eup %2036  ;;  %1043 = vadd.xlane.f32.xlu0 %v2035_v20  ;;  %1944 = vmatprep.mubr.f32.mxu1 %v2035_v20 }
 0x279   : > { %1049 = vadd.xlane.f32.xlu1 %v2037_v41  ;;  %1945 = vmatmul.mubr.f32.gmra.mxu1 %v2033_v63  ;;  %v2622_v45 = vpop.permute.xlu1 %1287  ;;  %v1016_v63 = vmul.f32 %v2557_v7, %v1000_v52  ;;  %v1253_v52 = vld [vmem:[#allocation4 + $0x20] sm:$0xff] }
 0x27b   : > { %v2039_v3 = vpop.eup %2038  ;;  %v2641_v8 = vpop.permute.xlu0 %1332 }
 0x27c   : > { %v2041_v26 = vpop.eup %2040  ;;  %1047 = vadd.xlane.f32.xlu0 %v2039_v3  ;;  %1947 = vmatprep.mubr.f32.mxu1 %v2039_v3 }
 0x27d   : > { %1053 = vadd.xlane.f32.xlu1 %v2041_v26  ;;  %1948 = vmatmul.mubr.f32.gmra.mxu1 %v2037_v41  ;;  %v2626_v36 = vpop.permute.xlu1 %1297  ;;  %v999_v41 = vld [vmem:[#allocation3 + $0x40] sm:$0xff] }
 0x27e   : > { %v1015_v5 = vmul.f32 %v2577_v13, %v999_v41  ;;  %v1003_v13 = vld [vmem:[#allocation3 + $0x60] sm:$0xff] }
 0x27f   : > { %v2043_v53 = vpop.eup %2042 }
 0x280   : > { %1051 = vadd.xlane.f32.xlu0 %v2043_v53  ;;  %1950 = vmatprep.mubr.f32.mxu1 %v2043_v53  ;;  %v2608_v42 = vpop.eup %2044 }
 0x281   : > { %1951 = vmatmul.mubr.f32.gmra.mxu1 %v2041_v26  ;;  %v2611_v21 = vpop.eup %2046  ;;  %v2630_v30 = vpop.permute.xlu1 %1307  ;;  %v1002_v26 = vld [vmem:[#allocation3 + $0x58] sm:$0xff] }
 0x282   : > { %v1018_v53 = vmul.f32 %v2565_v61, %v1002_v26 }
 0x285   : > { %v2634_v32 = vpop.permute.xlu1 %1317 }
 0x289   : > { %v2638_v46 = vpop.permute.xlu1 %1327 }
 0x28e   : > { %1337 = vperm.xlu1 %1983, %v2608_v42  }
 0x296   : > { %1342 = vperm.xlu0 %1982, %v2611_v21  }
 0x2dd   : > { %v1024_v17 = vpop.xlane.xlu1 %1023 }
 0x2de   : > { %v1055_v54 = vadd.f32 %v1024_v17, %v1007_v57  ;;  %v1004_v17 = vld [vmem:[#allocation3 + $0x68] sm:$0xff] }
 0x2e0   : > { %1072 = vst.msk [vmem:[#allocation3] sm:$0xff] %vm415_vm0, %v1055_v54  ;;  %v1020_v54 = vmul.f32 %v2571_v12, %v1004_v17  ;;  %v1021_v12 = vmul.f32 %v2608_v42, %v1005_v14  ;;  %v1251_v42 = vld [vmem:[#allocation4 + $0x10] sm:$0xff] }
 0x2e1   : > { %v1026_v19 = vpop.xlane.xlu0 %1025 }
 0x2e2   : > { %v1056_v25 = vadd.f32 %v1026_v19, %v1008_v18 }
 0x2e4   : > { %1073 = vst.msk [vmem:[#allocation3 + $0x8] sm:$0xff] %vm415_vm0, %v1056_v25  ;;  %v1006_v25 = vld [vmem:[#allocation3 + $0x78] sm:$0xff] }
 0x2e5   : > { %v1030_v58 = vpop.xlane.xlu1 %1029 }
 0x2e6   : > { %v1058_v29 = vadd.f32 %v1030_v58, %v1010_v50  ;;  %v1019_v50 = vmul.f32 %v2583_v15, %v1003_v13  ;;  %v1022_v58 = vmul.f32 %v2611_v21, %v1006_v25  ;;  %v1250_v15 = vld [vmem:[#allocation4 + $0x8] sm:$0xff]  ;;  %v1261_v25 = vld [vmem:[#allocation4 + $0x60] sm:$0xff] }
 0x2e7   : > { %v1262_v13 = vld [vmem:[#allocation4 + $0x68] sm:$0xff]  ;;  %v1357_v14 = vmul.f32 %v2638_v46, %v1261_v25 }
 0x2e8   : > { %1075 = vst.msk [vmem:[#allocation3 + $0x18] sm:$0xff] %vm415_vm0, %v1058_v29 }
 0x2e9   : > { %v1028_v33 = vpop.xlane.xlu0 %1027 }
 0x2ea   : > { %v1057_v55 = vadd.f32 %v1028_v33, %v1009_v51 }
 0x2ec   : > { %1074 = vst.msk [vmem:[#allocation3 + $0x10] sm:$0xff] %vm415_vm0, %v1057_v55 }
 0x2ed   : > { %v1034_v62 = vpop.xlane.xlu1 %1033 }
 0x2ee   : > { %v1060_v16 = vadd.f32 %v1034_v62, %v1012_v6  ;;  %v1249_v6 = vld [vmem:[#allocation4] sm:$0xff]  ;;  %v1346_v62 = vmul.f32 %v2614_v31, %v1250_v15 }
 0x2ef   : > { %v1345_v35 = vmul.f32 %v2616_v38, %v1249_v6  ;;  %v1254_v38 = vld [vmem:[#allocation4 + $0x28] sm:$0xff] }
 0x2f0   : > { %1077 = vst.msk [vmem:[#allocation3 + $0x28] sm:$0xff] %vm415_vm0, %v1060_v16 }
 0x2f1   : > { %v1032_v22 = vpop.xlane.xlu0 %1031 }
 0x2f2   : > { %v1059_v59 = vadd.f32 %v1032_v22, %v1011_v56 }
 0x2f4   : > { %1076 = vst.msk [vmem:[#allocation3 + $0x20] sm:$0xff] %vm415_vm0, %v1059_v59  ;;  %v1348_v59 = vmul.f32 %v2620_v24, %v1252_v47 }
 0x2f5   : > { %v1038_v37 = vpop.xlane.xlu1 %1037 }
 0x2f6   : > { %v1062_v48 = vadd.f32 %v1038_v37, %v1014_v9  ;;  %v1347_v37 = vmul.f32 %v2618_v0, %v1251_v42  ;;  %v1256_v0 = vld [vmem:[#allocation4 + $0x38] sm:$0xff] }
 0x2f7   : > { %v1352_v26 = vmul.f32 %v2628_v43, %v1256_v0  ;;  %v1259_v43 = vld [vmem:[#allocation4 + $0x50] sm:$0xff] }
 0x2f8   : > { %1079 = vst.msk [vmem:[#allocation3 + $0x38] sm:$0xff] %vm415_vm0, %v1062_v48 }
 0x2f9   : > { %v1036_v20 = vpop.xlane.xlu0 %1035 }
 0x2fa   : > { %v1042_v10 = vpop.xlane.xlu1 %1041  ;;  %v1061_v3 = vadd.f32 %v1036_v20, %v1013_v1  ;;  %v1350_v1 = vmul.f32 %v2624_v27, %v1254_v38  ;;  %v1349_v20 = vmul.f32 %v2622_v45, %v1253_v52  ;;  %v1257_v27 = vld [vmem:[#allocation4 + $0x40] sm:$0xff] }
 0x2fb   : > { %v1064_v39 = vadd.f32 %v1042_v10, %v1016_v63 }
 0x2fc   : > { %1078 = vst.msk [vmem:[#allocation3 + $0x30] sm:$0xff] %vm415_vm0, %v1061_v3  ;;  %v1255_v3 = vld [vmem:[#allocation4 + $0x30] sm:$0xff] }
 0x2fd   : > { %1081 = vst.msk [vmem:[#allocation3 + $0x48] sm:$0xff] %vm415_vm0, %v1064_v39  ;;  %v1040_v60 = vpop.xlane.xlu0 %1039  ;;  %v1258_v39 = vld [vmem:[#allocation4 + $0x48] sm:$0xff] }
 0x2fe   : > { %v1046_v57 = vpop.xlane.xlu1 %1045  ;;  %v1063_v11 = vadd.f32 %v1040_v60, %v1015_v5  ;;  %v1354_v45 = vmul.f32 %v2632_v4, %v1258_v39  ;;  %v1355_v4 = vmul.f32 %v2634_v32, %v1259_v43 }
 0x2ff   : > { %v1066_v7 = vadd.f32 %v1046_v57, %v1018_v53  ;;  %v1351_v53 = vmul.f32 %v2626_v36, %v1255_v3 }
 0x300   : > { %1080 = vst.msk [vmem:[#allocation3 + $0x40] sm:$0xff] %vm415_vm0, %v1063_v11  ;;  %v1260_v11 = vld [vmem:[#allocation4 + $0x58] sm:$0xff] }
 0x301   : > { %1083 = vst.msk [vmem:[#allocation3 + $0x58] sm:$0xff] %vm415_vm0, %v1066_v7  ;;  %v1044_v18 = vpop.xlane.xlu0 %1043  ;;  %v1353_v7 = vmul.f32 %v2630_v30, %v1257_v27  ;;  %v1358_v30 = vmul.f32 %v2641_v8, %v1262_v13 }
 0x302   : > { %v1050_v19 = vpop.xlane.xlu1 %1049  ;;  %v1065_v23 = vadd.f32 %v1044_v18, %v1017_v49  ;;  %v1356_v18 = vmul.f32 %v2636_v40, %v1260_v11 }
 0x303   : > { %v1068_v61 = vadd.f32 %v1050_v19, %v1020_v54 }
 0x304   : > { %1082 = vst.msk [vmem:[#allocation3 + $0x50] sm:$0xff] %vm415_vm0, %v1065_v23 }
 0x305   : > { %1085 = vst.msk [vmem:[#allocation3 + $0x68] sm:$0xff] %vm415_vm0, %v1068_v61  ;;  %v1048_v28 = vpop.xlane.xlu0 %1047 }
 0x306   : > { %v1054_v29 = vpop.xlane.xlu1 %1053  ;;  %v1067_v51 = vadd.f32 %v1048_v28, %v1019_v50 }
 0x307   : > { %v1070_v33 = vadd.f32 %v1054_v29, %v1022_v58  ;;  %v1264_v58 = vld [vmem:[#allocation4 + $0x78] sm:$0xff] }
 0x308   : > { %1084 = vst.msk [vmem:[#allocation3 + $0x60] sm:$0xff] %vm415_vm0, %v1067_v51  ;;  %v1263_v51 = vld [vmem:[#allocation4 + $0x70] sm:$0xff] }
 0x309   : > { %1087 = vst.msk [vmem:[#allocation3 + $0x78] sm:$0xff] %vm415_vm0, %v1070_v33  ;;  %v1052_v34 = vpop.xlane.xlu0 %1051 }
 0x30a   : > { %v1069_v55 = vadd.f32 %v1052_v34, %v1021_v12  ;;  %v1338_v32 = vpop.permute.xlu1 %1337 }
 0x30b   : > { %v1359_v8 = vmul.f32 %v1338_v32, %v1263_v51 }
 0x30c   : > { %1086 = vst.msk [vmem:[#allocation3 + $0x70] sm:$0xff] %vm415_vm0, %v1069_v55 }
 0x311   : > { %v1343_v28 = vpop.permute.xlu0 %1342 }
 0x312   : > { %v1360_v12 = vmul.f32 %v1343_v28, %v1264_v58 }
 0x318   : > { %v1931_v21 = vpop.f32.mrf.mxu1 }
 0x319   : > { %v1362_v16 = vadd.f32 %v1931_v21, %v1346_v62 }
 0x31a   : > { %v1170_v56 = vpop.f32.mrf.mxu1 }
 0x31b   : > { %1378 = vst.msk [vmem:[#allocation4 + $0x8] sm:$0xff] %vm448_vm1, %v1362_v16  ;;  %v1361_v22 = vadd.f32 %v1345_v35, %v1170_v56 }
 0x31d   : > { %1377 = vst.msk [vmem:[#allocation4] sm:$0xff] %vm448_vm1, %v1361_v22 }
 0x321   : > { %v1934_v9 = vpop.f32.mrf.mxu1 }
 0x322   : > { %v1364_v2 = vadd.f32 %v1934_v9, %v1348_v59 }
 0x323   : > { %v1180_v48 = vpop.f32.mrf.mxu1 }
 0x324   : > { %1380 = vst.msk [vmem:[#allocation4 + $0x18] sm:$0xff] %vm448_vm1, %v1364_v2  ;;  %v1363_v31 = vadd.f32 %v1347_v37, %v1180_v48 }
 0x326   : > { %1379 = vst.msk [vmem:[#allocation4 + $0x10] sm:$0xff] %vm448_vm1, %v1363_v31 }
 0x329   : > { %v1937_v63 = vpop.f32.mrf.mxu1 }
 0x32a   : > { %v1366_v41 = vadd.f32 %v1937_v63, %v1350_v1 }
 0x32b   : > { %v1190_v10 = vpop.f32.mrf.mxu1 }
 0x32c   : > { %1382 = vst.msk [vmem:[#allocation4 + $0x28] sm:$0xff] %vm448_vm1, %v1366_v41  ;;  %v1365_v24 = vadd.f32 %v1349_v20, %v1190_v10 }
 0x32e   : > { %1381 = vst.msk [vmem:[#allocation4 + $0x20] sm:$0xff] %vm448_vm1, %v1365_v24 }
 0x331   : > { %v1940_v5 = vpop.f32.mrf.mxu1 }
 0x332   : > { %v1368_v60 = vadd.f32 %v1940_v5, %v1352_v26 }
 0x333   : > { %v1200_v44 = vpop.f32.mrf.mxu1 }
 0x334   : > { %1384 = vst.msk [vmem:[#allocation4 + $0x38] sm:$0xff] %vm448_vm1, %v1368_v60  ;;  %v1367_v57 = vadd.f32 %v1351_v53, %v1200_v44 }
 0x335   : > { %v1943_v17 = vpop.f32.mrf.mxu1 }
 0x336   : > { %1383 = vst.msk [vmem:[#allocation4 + $0x30] sm:$0xff] %vm448_vm1, %v1367_v57  ;;  %v1370_v49 = vadd.f32 %v1943_v17, %v1354_v45 }
 0x337   : > { %v1210_v54 = vpop.f32.mrf.mxu1 }
 0x338   : > { %1386 = vst.msk [vmem:[#allocation4 + $0x48] sm:$0xff] %vm448_vm1, %v1370_v49  ;;  %v1369_v36 = vadd.f32 %v1353_v7, %v1210_v54 }
 0x339   : > { %v1946_v19 = vpop.f32.mrf.mxu1 }
 0x33a   : > { %1385 = vst.msk [vmem:[#allocation4 + $0x40] sm:$0xff] %vm448_vm1, %v1369_v36  ;;  %v1372_v23 = vadd.f32 %v1946_v19, %v1356_v18 }
 0x33b   : > { %v1220_v61 = vpop.f32.mrf.mxu1 }
 0x33c   : > { %1388 = vst.msk [vmem:[#allocation4 + $0x58] sm:$0xff] %vm448_vm1, %v1372_v23  ;;  %v1371_v50 = vadd.f32 %v1355_v4, %v1220_v61 }
 0x33d   : > { %v1949_v40 = vpop.f32.mrf.mxu1 }
 0x33e   : > { %1387 = vst.msk [vmem:[#allocation4 + $0x50] sm:$0xff] %vm448_vm1, %v1371_v50  ;;  %v1374_v29 = vadd.f32 %v1949_v40, %v1358_v30 }
 0x33f   : > { %v1230_v33 = vpop.f32.mrf.mxu1 }
 0x340   : > { %1390 = vst.msk [vmem:[#allocation4 + $0x68] sm:$0xff] %vm448_vm1, %v1374_v29  ;;  %v1373_v34 = vadd.f32 %v1357_v14, %v1230_v33 }
 0x341   : > { %v1952_v55 = vpop.f32.mrf.mxu1 }
 0x342   : > { %1389 = vst.msk [vmem:[#allocation4 + $0x60] sm:$0xff] %vm448_vm1, %v1373_v34  ;;  %v1376_v15 = vadd.f32 %v1952_v55, %v1360_v12 }
 0x343   : > { %v1240_v6 = vpop.f32.mrf.mxu1 }
 0x344   : > { %1392 = vst.msk [vmem:[#allocation4 + $0x78] sm:$0xff] %vm448_vm1, %v1376_v15  ;;  %v1375_v62 = vadd.f32 %v1359_v8, %v1240_v6 }
 0x346   : > { %1391 = vst.msk [vmem:[#allocation4 + $0x70] sm:$0xff] %vm448_vm1, %v1375_v62 }
 0x347 PF: > { %v1430_v46 = vld [vmem:[#allocation3 + $0x10] sm:$0xff]  ;;  %v1428_v21 = vld [vmem:[#allocation3] sm:$0xff]  ;;  %v2124_v35 = vmov 0   ;;  %v1431_v16 = vld [vmem:[#allocation3 + $0x18] sm:$0xff] }
 0x348   : > { %2049 = vset.pattern.permute.xlu1 %v2124_v35  ;;  %2048 = vset.pattern.permute.xlu0 %v2124_v35  ;;  %v1429_v56 = vld [vmem:[#allocation3 + $0x8] sm:$0xff]  ;;  %v1432_v47 = vld [vmem:[#allocation3 + $0x20] sm:$0xff]  ;;  %v1435_v42 = vld [vmem:[#allocation3 + $0x38] sm:$0xff] }
 0x349   : > { %1456 = vperm.xlu1 %2049, %v1430_v46   ;;  %1446 = vperm.xlu0 %2048, %v1428_v21   ;;  %v1433_v22 = vld [vmem:[#allocation3 + $0x28] sm:$0xff]  ;;  %v1434_v59 = vld [vmem:[#allocation3 + $0x30] sm:$0xff]  ;;  %v1436_v37 = vld [vmem:[#allocation3 + $0x40] sm:$0xff] }
 0x34a   : > { %v1437_v9 = vld [vmem:[#allocation3 + $0x48] sm:$0xff]  ;;  %v1439_v2 = vld [vmem:[#allocation3 + $0x58] sm:$0xff]  ;;  %v1438_v48 = vld [vmem:[#allocation3 + $0x50] sm:$0xff] }
 0x34b   : > { %v1441_v31 = vld [vmem:[#allocation3 + $0x68] sm:$0xff]  ;;  %v1440_v38 = vld [vmem:[#allocation3 + $0x60] sm:$0xff]  ;;  %v1443_v52 = vld [vmem:[#allocation3 + $0x78] sm:$0xff] }
 0x34c   : > { %v1442_v1 = vld [vmem:[#allocation3 + $0x70] sm:$0xff]  ;;  %v1412_v5 = vld [vmem:[#allocation4] sm:$0xff]  ;;  %v1415_v45 = vld [vmem:[#allocation4 + $0x18] sm:$0xff] }
 0x34d   : > { %1461 = vperm.xlu1 %2049, %v1431_v16   ;;  %1451 = vperm.xlu0 %2048, %v1429_v56   ;;  %v1414_v3 = vld [vmem:[#allocation4 + $0x10] sm:$0xff]  ;;  %v1413_v17 = vld [vmem:[#allocation4 + $0x8] sm:$0xff]  ;;  %v1416_v19 = vld [vmem:[#allocation4 + $0x20] sm:$0xff] }
 0x34e   : > { %v1417_v18 = vld [vmem:[#allocation4 + $0x28] sm:$0xff]  ;;  %v1419_v30 = vld [vmem:[#allocation4 + $0x38] sm:$0xff]  ;;  %v1418_v28 = vld [vmem:[#allocation4 + $0x30] sm:$0xff] }
 0x34f   : > { %v1421_v32 = vld [vmem:[#allocation4 + $0x48] sm:$0xff]  ;;  %v1420_v34 = vld [vmem:[#allocation4 + $0x40] sm:$0xff]  ;;  %v1423_v62 = vld [vmem:[#allocation4 + $0x58] sm:$0xff] }
 0x350   : > { %v1422_v46 = vld [vmem:[#allocation4 + $0x50] sm:$0xff] }
 0x351   : > { %1471 = vperm.xlu1 %2049, %v1433_v22   ;;  %1466 = vperm.xlu0 %2048, %v1432_v47   ;;  %v1425_v22 = vld [vmem:[#allocation4 + $0x68] sm:$0xff]  ;;  %v1424_v47 = vld [vmem:[#allocation4 + $0x60] sm:$0xff] }
 0x355   : > { %1481 = vperm.xlu1 %2049, %v1435_v42   ;;  %1476 = vperm.xlu0 %2048, %v1434_v59  }
 0x359   : > { %1491 = vperm.xlu1 %2049, %v1437_v9   ;;  %1486 = vperm.xlu0 %2048, %v1436_v37  }
 0x35d   : > { %1501 = vperm.xlu1 %2049, %v1439_v2   ;;  %1496 = vperm.xlu0 %2048, %v1438_v48   ;;  %v1427_v2 = vld [vmem:[#allocation4 + $0x78] sm:$0xff]  ;;  %v1426_v48 = vld [vmem:[#allocation4 + $0x70] sm:$0xff] }
 0x361   : > { %1511 = vperm.xlu1 %2049, %v1441_v31   ;;  %1506 = vperm.xlu0 %2048, %v1440_v38  }
 0x365   : > { %1521 = vperm.xlu1 %2049, %v1443_v52   ;;  %1516 = vperm.xlu0 %2048, %v1442_v1  }
 0x3c4   : > { %v1457_v63 = vpop.permute.xlu1 %1456  ;;  %v1447_v20 = vpop.permute.xlu0 %1446 }
 0x3c5   : > { %2050 = vrcp.f32 %v1457_v63 }
 0x3c6   : > { %2052 = vrcp.f32 %v1447_v20 }
 0x3c8   : > { %v1462_v41 = vpop.permute.xlu1 %1461  ;;  %v1452_v10 = vpop.permute.xlu0 %1451 }
 0x3c9   : > { %2054 = vrcp.f32 %v1462_v41 }
 0x3ca   : > { %2056 = vrcp.f32 %v1452_v10 }
 0x3cc   : > { %v1472_v24 = vpop.permute.xlu1 %1471  ;;  %v1467_v0 = vpop.permute.xlu0 %1466 }
 0x3cd   : > { %2058 = vrcp.f32 %v1472_v24 }
 0x3ce   : > { %2060 = vrcp.f32 %v1467_v0 }
 0x3d0   : > { %v1482_v26 = vpop.permute.xlu1 %1481  ;;  %v1477_v39 = vpop.permute.xlu0 %1476 }
 0x3d1   : > { %2062 = vrcp.f32 %v1482_v26 }
 0x3d2   : > { %v2051_v53 = vpop.eup %2050  ;;  %2064 = vrcp.f32 %v1477_v39 }
 0x3d3   : > { %v2053_v60 = vpop.eup %2052  ;;  %v1529_v27 = vmul.f32 %v2051_v53, %v1414_v3 }
 0x3d4   : > { %v1525_v44 = vmul.f32 %v2053_v60, %v1412_v5  ;;  %v1492_v57 = vpop.permute.xlu1 %1491  ;;  %v1487_v11 = vpop.permute.xlu0 %1486 }
 0x3d5   : > { %1559 = vst.msk [vmem:[%s2248_s11 + $0x10] sm:$0xff] %vm448_vm1, %v1529_v27  ;;  %2066 = vrcp.f32 %v1492_v57 }
 0x3d6   : > { %v2055_v7 = vpop.eup %2054  ;;  %1557 = vst.msk [vmem:[%s2248_s11] sm:$0xff] %vm448_vm1, %v1525_v44  ;;  %2068 = vrcp.f32 %v1487_v11 }
 0x3d7   : > { %v2057_v49 = vpop.eup %2056  ;;  %v1531_v43 = vmul.f32 %v2055_v7, %v1415_v45 }
 0x3d8   : > { %v1527_v54 = vmul.f32 %v2057_v49, %v1413_v17  ;;  %v1502_v36 = vpop.permute.xlu1 %1501  ;;  %v1497_v13 = vpop.permute.xlu0 %1496 }
 0x3d9   : > { %1560 = vst.msk [vmem:[%s2248_s11 + $0x18] sm:$0xff] %vm448_vm1, %v1531_v43  ;;  %2070 = vrcp.f32 %v1502_v36 }
 0x3da   : > { %v2059_v4 = vpop.eup %2058  ;;  %1558 = vst.msk [vmem:[%s2248_s11 + $0x8] sm:$0xff] %vm448_vm1, %v1527_v54  ;;  %2072 = vrcp.f32 %v1497_v13 }
 0x3db   : > { %v2061_v23 = vpop.eup %2060  ;;  %v1535_v25 = vmul.f32 %v2059_v4, %v1417_v18 }
 0x3dc   : > { %v1533_v61 = vmul.f32 %v2061_v23, %v1416_v19  ;;  %v1512_v50 = vpop.permute.xlu1 %1511  ;;  %v1507_v58 = vpop.permute.xlu0 %1506 }
 0x3dd   : > { %1562 = vst.msk [vmem:[%s2248_s11 + $0x28] sm:$0xff] %vm448_vm1, %v1535_v25  ;;  %2074 = vrcp.f32 %v1512_v50 }
 0x3de   : > { %v2063_v40 = vpop.eup %2062  ;;  %1561 = vst.msk [vmem:[%s2248_s11 + $0x20] sm:$0xff] %vm448_vm1, %v1533_v61  ;;  %2076 = vrcp.f32 %v1507_v58 }
 0x3df   : > { %v2065_v14 = vpop.eup %2064  ;;  %v1539_v29 = vmul.f32 %v2063_v40, %v1419_v30 }
 0x3e0   : > { %v1537_v51 = vmul.f32 %v2065_v14, %v1418_v28  ;;  %v1522_v33 = vpop.permute.xlu1 %1521  ;;  %v1517_v12 = vpop.permute.xlu0 %1516 }
 0x3e1   : > { %1564 = vst.msk [vmem:[%s2248_s11 + $0x38] sm:$0xff] %vm448_vm1, %v1539_v29  ;;  %2078 = vrcp.f32 %v1522_v33 }
 0x3e2   : > { %v2067_v55 = vpop.eup %2066  ;;  %1563 = vst.msk [vmem:[%s2248_s11 + $0x30] sm:$0xff] %vm448_vm1, %v1537_v51  ;;  %2080 = vrcp.f32 %v1517_v12 }
 0x3e3   : > { %v2069_v8 = vpop.eup %2068  ;;  %v1543_v15 = vmul.f32 %v2067_v55, %v1421_v32 }
 0x3e4   : > { %v1541_v6 = vmul.f32 %v2069_v8, %v1420_v34 }
 0x3e5   : > { %1566 = vst.msk [vmem:[%s2248_s11 + $0x48] sm:$0xff] %vm448_vm1, %v1543_v15 }
 0x3e6   : > { %v2071_v21 = vpop.eup %2070  ;;  %1565 = vst.msk [vmem:[%s2248_s11 + $0x40] sm:$0xff] %vm448_vm1, %v1541_v6 }
 0x3e7   : > { %v2073_v35 = vpop.eup %2072  ;;  %v1547_v16 = vmul.f32 %v2071_v21, %v1423_v62 }
 0x3e8   : > { %v1545_v56 = vmul.f32 %v2073_v35, %v1422_v46 }
 0x3e9   : > { %1568 = vst.msk [vmem:[%s2248_s11 + $0x58] sm:$0xff] %vm448_vm1, %v1547_v16 }
 0x3ea   : > { %v2075_v42 = vpop.eup %2074  ;;  %1567 = vst.msk [vmem:[%s2248_s11 + $0x50] sm:$0xff] %vm448_vm1, %v1545_v56 }
 0x3eb   : > { %v2077_v59 = vpop.eup %2076  ;;  %v1551_v9 = vmul.f32 %v2075_v42, %v1425_v22 }
 0x3ec   : > { %v1549_v37 = vmul.f32 %v2077_v59, %v1424_v47 }
 0x3ed   : > { %1570 = vst.msk [vmem:[%s2248_s11 + $0x68] sm:$0xff] %vm448_vm1, %v1551_v9 }
 0x3ee   : > { %v2079_v31 = vpop.eup %2078  ;;  %1569 = vst.msk [vmem:[%s2248_s11 + $0x60] sm:$0xff] %vm448_vm1, %v1549_v37 }
 0x3ef   : > { %v2081_v38 = vpop.eup %2080  ;;  %v1555_v52 = vmul.f32 %v2079_v31, %v1427_v2 }
 0x3f0   : > { %v1553_v1 = vmul.f32 %v2081_v38, %v1426_v48 }
 0x3f1   : > { %1572 = vst.msk [vmem:[%s2248_s11 + $0x78] sm:$0xff] %vm448_vm1, %v1555_v52 }
 0x3f2   : > { %1571 = vst.msk [vmem:[%s2248_s11 + $0x70] sm:$0xff] %vm448_vm1, %v1553_v1 }
 0x3f3 PF: > { %s21_s25 = sadd.s32 1, %s2118_s25   ;;  %s2751_s23 = smov %s2114_s24 }
 0x3f4   : > { %p18_p3 = scmp.ge.s32.totalorder %s21_s25, 4   ;;  %s2752_s24 = smov %s2754_s0 }
 0x3f6   :  { %20 = sbr.rel (!%p18_p3) target bundleno = 17 (0x11), region = 87 }

</bundles_post_ra>
